<compile_context>
chip_gen: v5e
topology: v5e:2x2
jax: 0.10.0
libtpu: 0.0.40
codegen_flags: <defaults>
</compile_context>

<pallas_src>
import functools

import jax
import jax.numpy as jnp
from jax.experimental import pallas as pl
from jax.experimental.pallas import tpu as pltpu


# --------------------------------------------------------------------------- helpers
def _leaky(y, a):
    return jnp.where(y >= 0, y, a * y)


# ----------------------------------------------------------------------- fused kernel
def _genconv_fused_kernel(*refs, scale, wp, dims, paddings, leakiness, cdt):
    """One image's whole GenConvBlock conv stack on a (channels, M) VMEM activation.

    M = Hp*Wp (upscaled spatial + zero border ring, flattened row-major) rounded up to
    a lane-dense multiple of 256.  A 'same'-conv tap (di, dj) with padding p is an XLU
    lane roll by (di-p)*Wp + (dj-p); the k*k rolled copies are stacked into a
    (k*k*Cin, M) im2col block and contracted with the (Cout, k*k*Cin) weight in a
    single MXU matmul with f32 accumulation.  Bias + LeakyReLU run in f32, then the
    border ring / lane tail is re-zeroed (acts as the next layer's zero padding).
    """
    n_conv = len(dims)
    x_ref, mask_ref = refs[0], refs[1]
    i = 2
    if scale > 1:
        pmask_ref, wd_ref, bd_ref = refs[2], refs[3], refs[4]
        i = 5
    conv_wb = [(refs[i + 2 * l], refs[i + 2 * l + 1]) for l in range(n_conv)]
    i += 2 * n_conv
    wr_ref, br_ref = refs[i], refs[i + 1]
    feat_ref, rgb_ref = refs[i + 2], refs[i + 3]

    mask = mask_ref[...]                            # (1, M) f32, 1 on interior pixels
    mw = mask.shape[1]
    h = x_ref[0]                                    # (C0, M) compute dtype

    # Hoist the interior-mask broadcast per distinct channel count (JAX does not CSE
    # broadcast_in_dim).
    mcache = {}

    def bmask(c):
        if c not in mcache:
            mcache[c] = jnp.broadcast_to(mask, (c, mw))
        return mcache[c]

    def shifted(a, off):
        # result[:, r] = a[:, r + off]; wrapped lanes only land on masked positions.
        if off == 0:
            return a
        return pltpu.roll(a, shift=(-off) % mw, axis=1)

    if scale > 1:
        # ConvTranspose2d(kernel=stride=scale): output pixel (i, j) only sees kernel
        # tap (i%s, j%s) applied to the nearest-upsampled input at the same pixel, so
        # stacking the input masked to each sub-pixel parity turns the deconv into one
        # (Cd, s*s*C0) @ (s*s*C0, M) matmul.
        pm = pmask_ref[...]                         # (s*s, M) 0/1 in compute dtype
        s2 = scale * scale
        stack = jnp.concatenate([h * pm[p:p + 1, :] for p in range(s2)], axis=0)
        acc = jnp.dot(wd_ref[...], stack, preferred_element_type=jnp.float32)
        # The PyTorch module uses LeakyReLU(0.2) after the deconv regardless of
        # `leakiness` (matches the reference).
        h32 = _leaky(acc + bd_ref[...], 0.2) * bmask(acc.shape[0])
        h = h32.astype(cdt)
    else:
        h32 = h.astype(jnp.float32)

    # Conv2d(k, padding=p) + LeakyReLU layers: one fused matmul per layer.
    for (w_ref, b_ref), k, p in zip(conv_wb, dims, paddings):
        row = {0: h}
        for dr in range(-p, p + 1):                 # ±Wp row rolls first ...
            if dr != 0:
                row[dr] = shifted(h, dr * wp)
        taps = []
        for t in range(k * k):                      # ... then ±1..±p column rolls
            dr, dc = t // k - p, t % k - p
            taps.append(shifted(row[dr], dc))
        stack = jnp.concatenate(taps, axis=0) if len(taps) > 1 else taps[0]
        acc = jnp.dot(w_ref[...], stack, preferred_element_type=jnp.float32)
        h32 = _leaky(acc + b_ref[...], leakiness) * bmask(acc.shape[0])
        h = h32.astype(cdt)

    feat_ref[0] = h32.astype(feat_ref.dtype)                       # conv-stack output
    rgb = jnp.dot(wr_ref[...], h, preferred_element_type=jnp.float32) + br_ref[...]
    rgb_ref[0] = rgb.astype(rgb_ref.dtype)                         # 1x1 torgb conv


# --------------------------------------------------------------------------- JAX glue
def avgpool_then_nearest_up(x_nchw, s):
    B, C, H, W = x_nchw.shape
    pooled = x_nchw.reshape(B, C, H // s, s, W // s, s).mean(axis=(3, 5))
    return jnp.repeat(jnp.repeat(pooled, s, axis=2), s, axis=3)


def bilinear_upsample(x_nchw, s):
    # F.upsample(scale_factor=s, mode='bilinear') == F.interpolate(align_corners=False)
    B, C, H, W = x_nchw.shape
    oh = jnp.arange(H * s, dtype=jnp.float32)
    ow = jnp.arange(W * s, dtype=jnp.float32)
    src_h = jnp.maximum((oh + 0.5) / s - 0.5, 0.0)
    src_w = jnp.maximum((ow + 0.5) / s - 0.5, 0.0)
    h0 = jnp.floor(src_h).astype(jnp.int32)
    w0 = jnp.floor(src_w).astype(jnp.int32)
    h1 = jnp.minimum(h0 + 1, H - 1)
    w1 = jnp.minimum(w0 + 1, W - 1)
    lh = (src_h - h0).astype(x_nchw.dtype)
    lw = (src_w - w0).astype(x_nchw.dtype)
    xh = (x_nchw[:, :, h0, :] * (1.0 - lh)[None, None, :, None]
          + x_nchw[:, :, h1, :] * lh[None, None, :, None])
    out = (xh[:, :, :, w0] * (1.0 - lw)[None, None, None, :]
           + xh[:, :, :, w1] * lw[None, None, None, :])
    return out


# ------------------------------------------------------------------------- forward
def genconvblock_forward(x_nchw, prgb_nchw, params, *, scale, paddings,
                         leakiness=0.2, subtract_mean=True,
                         compute_dtype=jnp.bfloat16, out_dtype=jnp.float32):
    B, _, H, W = x_nchw.shape
    s = int(scale)
    cdt = compute_dtype

    conv_ws = [w for (w, _) in params["convs"]]
    dims = tuple(int(w.shape[2]) for w in conv_ws)
    paddings = tuple(int(p) for p in paddings)
    for d, p in zip(dims, paddings):
        # TODO(synk): spatial-shrinking convs (dim != 2*pad+1) would need a per-layer
        # re-layout of the flat buffer; not needed for the canonical config.
        assert d == 2 * p + 1, "fused kernel supports 'same' convolutions only"

    Hs, Ws = H * s, W * s
    P = max(paddings + (1,))                      # zero border ring width
    Hp, Wp = Hs + 2 * P, Ws + 2 * P
    Mraw = Hp * Wp
    LANE = 256                                    # v6e/v7x MXU column-group alignment
    Mimg = ((Mraw + LANE - 1) // LANE) * LANE     # per-image lane-dense flat length

    xin = jnp.concatenate([x_nchw, prgb_nchw], axis=1)        # (B, C0, H, W)
    C0 = int(xin.shape[1])

    # Nearest-upsampled (scale>1), zero-bordered, per-image-flattened input (no s^2x
    # parity one-hot blowup; parity selection happens in-kernel with lane masks).
    xu = jnp.repeat(jnp.repeat(xin, s, axis=2), s, axis=3) if s > 1 else xin
    xu = jnp.pad(xu, ((0, 0), (0, 0), (P, P), (P, P)))        # (B, C0, Hp, Wp)
    xsel = jnp.pad(xu.reshape(B, C0, Mraw), ((0, 0), (0, 0), (0, Mimg - Mraw)))
    xsel = xsel.astype(cdt)

    ii = jnp.arange(Hp)
    jj = jnp.arange(Wp)
    m2d = (((ii >= P) & (ii < P + Hs))[:, None]
           & ((jj >= P) & (jj < P + Ws))[None, :]).astype(jnp.float32)
    mask = jnp.pad(m2d.reshape(1, Mraw), ((0, 0), (0, Mimg - Mraw)))    # (1, Mimg)

    ops, in_specs = [], []

    def add(arr, spec):
        ops.append(arr)
        in_specs.append(spec)

    def per_image(c):                              # one image's block per grid step
        return pl.BlockSpec((1, c, Mimg), lambda b: (b, 0, 0))

    def resident(arr):                             # constant index -> stays in VMEM
        return pl.BlockSpec(arr.shape, lambda b: (0, 0))

    add(xsel, per_image(C0))
    add(mask, resident(mask))

    if s > 1:
        # Sub-pixel parity lane masks: pixel (i, j) belongs to deconv tap
        # ((i - P) % s, (j - P) % s).
        par = (((jnp.arange(Hp) - P) % s)[:, None] * s
               + ((jnp.arange(Wp) - P) % s)[None, :]).reshape(Mraw)
        pmask = (par[None, :] == jnp.arange(s * s)[:, None]).astype(cdt)
        pmask = jnp.pad(pmask, ((0, 0), (0, Mimg - Mraw)))              # (s*s, Mimg)
        cd = int(params["w_dc"].shape[1])
        wd = jnp.transpose(params["w_dc"], (1, 2, 3, 0)).reshape(cd, s * s * C0)
        wd = wd.astype(cdt)
        bd = params["b_dc"].reshape(cd, 1).astype(jnp.float32)
        add(pmask, resident(pmask))
        add(wd, resident(wd))
        add(bd, resident(bd))

    for (w, b), k in zip(params["convs"], dims):
        cout, cin = int(w.shape[0]), int(w.shape[1])
        # (Cout, Cin, k, k) -> (Cout, k*k*Cin), tap-major / channel-minor, matching the
        # in-kernel im2col stack order.
        wk = jnp.transpose(w, (0, 2, 3, 1)).reshape(cout, k * k * cin).astype(cdt)
        bk = b.reshape(cout, 1).astype(jnp.float32)
        add(wk, resident(wk))
        add(bk, resident(bk))

    cf = int(conv_ws[-1].shape[0]) if conv_ws else \
        (int(params["w_dc"].shape[1]) if s > 1 else C0)
    wr = params["w_rgb"].reshape(3, cf).astype(cdt)
    br = params["b_rgb"].reshape(3, 1).astype(jnp.float32)
    add(wr, resident(wr))
    add(br, resident(br))

    # Explicit scoped-VMEM budget: v5e's default is only 16 MiB (of 128 physical) and
    # v7x has 64 MiB physical, so size per-step footprint and cap with headroom.
    cb = jnp.dtype(cdt).itemsize
    ob = jnp.dtype(out_dtype).itemsize
    stack_rows = [C0] + [k * k * int(w.shape[1]) for w in conv_ws]
    if s > 1:
        stack_rows.append(s * s * C0)
    live_rows = [C0, cf, 3] + [int(w.shape[0]) for w in conv_ws]
    est = Mimg * (2 * C0 * cb                           # double-buffered input block
                  + 2 * (cf + 3) * ob                   # double-buffered output blocks
                  + (1 + (s * s if s > 1 else 0)) * 4   # interior + parity masks
                  + max(stack_rows) * cb                # largest im2col stack
                  + 4 * max(live_rows) * 4)             # f32 acc + live activations
    vmem_limit = int(min(48 * 2 ** 20, max(16 * 2 ** 20, 4 * est)))

    kern = functools.partial(_genconv_fused_kernel, scale=s, wp=Wp, dims=dims,
                             paddings=paddings, leakiness=float(leakiness), cdt=cdt)

    # TODO(synk): for very large images a second (spatial) grid axis tiling Hp*Wp is
    # needed; here one image's activations are assumed to fit VMEM.
    feat_t, rgb_t = pl.pallas_call(
        kern,
        grid_spec=pltpu.PrefetchScalarGridSpec(
            num_scalar_prefetch=0,
            grid=(B,),
            in_specs=in_specs,
            out_specs=(per_image(cf), per_image(3))),
        out_shape=(jax.ShapeDtypeStruct((B, cf, Mimg), out_dtype),
                   jax.ShapeDtypeStruct((B, 3, Mimg), out_dtype)),
        compiler_params=pltpu.CompilerParams(
            dimension_semantics=("parallel",),      # v7x: shard batch over both TCs
            vmem_limit_bytes=vmem_limit),
    )(*ops)

    def to_nchw(a, c):
        a = a[:, :, :Mraw].reshape(B, c, Hp, Wp)[:, :, P:P + Hs, P:P + Ws]
        return a.astype(jnp.float32)

    feat = to_nchw(feat_t, cf)                        # (B, Cf, Hs, Ws)
    rgb = to_nchw(rgb_t, 3)                           # (B, 3,  Hs, Ws)

    # Trivial elementwise / index composition stays in plain jnp (XLA fuses it).
    if subtract_mean and s > 1:
        rgb = rgb - avgpool_then_nearest_up(rgb, s)
    prgb_up = bilinear_upsample(prgb_nchw, s) if s > 1 else prgb_nchw
    rgb = prgb_up + rgb
    return feat, rgb


# -------------------------------------------------------------- pure-JAX reference
def reference_forward(x_nchw, prgb_nchw, params, *, scale, paddings,
                      leakiness=0.2, subtract_mean=True):
    dn = ("NCHW", "OIHW", "NCHW")
    prec = jax.lax.Precision.HIGHEST
    h = jnp.concatenate([x_nchw, prgb_nchw], axis=1)
    if scale > 1:
        w = params["w_dc"]                                       # (Cin, Cout, s, s)
        w_oihw = jnp.transpose(w, (1, 0, 2, 3))[:, :, ::-1, ::-1]
        h = jax.lax.conv_general_dilated(
            h, w_oihw, window_strides=(1, 1),
            padding=[(scale - 1, scale - 1)] * 2, lhs_dilation=(scale, scale),
            dimension_numbers=dn, precision=prec)
        h = _leaky(h + params["b_dc"].reshape(1, -1, 1, 1), 0.2)
    for (w, b), p in zip(params["convs"], paddings):
        h = jax.lax.conv_general_dilated(h, w, (1, 1), [(p, p)] * 2,
                                         dimension_numbers=dn, precision=prec)
        h = _leaky(h + b.reshape(1, -1, 1, 1), leakiness)
    rgb = jax.lax.conv_general_dilated(h, params["w_rgb"], (1, 1), [(0, 0)] * 2,
                                       dimension_numbers=dn, precision=prec)
    rgb = rgb + params["b_rgb"].reshape(1, -1, 1, 1)
    if subtract_mean and scale > 1:
        rgb = rgb - avgpool_then_nearest_up(rgb, scale)
    prgb_up = bilinear_upsample(prgb_nchw, scale) if scale > 1 else prgb_nchw
    rgb = prgb_up + rgb
    return h, rgb


# ---------------------------------------------------------------------------- main
if __name__ == "__main__":
    # Module config: GenConvBlock(scale=2, inp_channels=4, channels=(8, 8),
    #                             dims=(3, 3), paddings=(1, 1))
    scale, inp_channels = 2, 4
    channels, dims, paddings = (8, 8), (3, 3), (1, 1)
    B, H, W = 2, 16, 16

    key = jax.random.PRNGKey(0)
    ks = jax.random.split(key, 10)

    def nrm(k, shape, s=0.1):
        return (s * jax.random.normal(k, shape)).astype(jnp.float32)

    params = {
        # ConvTranspose2d(inp_channels+3 -> inp_channels, kernel=stride=scale)
        "w_dc": nrm(ks[0], (inp_channels + 3, inp_channels, scale, scale)),
        "b_dc": nrm(ks[1], (inp_channels,)),
        "convs": [
            (nrm(ks[2], (channels[0], inp_channels, dims[0], dims[0])),
             nrm(ks[3], (channels[0],))),
            (nrm(ks[4], (channels[1], channels[0], dims[1], dims[1])),
             nrm(ks[5], (channels[1],))),
        ],
        "w_rgb": nrm(ks[6], (3, channels[-1], 1, 1)),
        "b_rgb": nrm(ks[7], (3,)),
    }
    x = nrm(ks[8], (B, inp_channels, H, W), s=1.0)      # NCHW like PyTorch
    prevrgb = nrm(ks[9], (B, 3, H, W), s=1.0)

    feat_ref, rgb_ref = reference_forward(x, prevrgb, params, scale=scale,
                                          paddings=paddings, leakiness=0.2,
                                          subtract_mean=True)

    # f32 operands + f32 outputs: tight check against the XLA reference.
    fwd_f32 = jax.jit(functools.partial(
        genconvblock_forward, scale=scale, paddings=paddings, leakiness=0.2,
        subtract_mean=True, compute_dtype=jnp.float32, out_dtype=jnp.float32))
    feat, rgb = fwd_f32(x, prevrgb, params)
    jax.block_until_ready((feat, rgb))
    assert feat.shape == (B, channels[-1], H * scale, W * scale)
    assert rgb.shape == (B, 3, H * scale, W * scale)
    assert jnp.allclose(feat, feat_ref, rtol=1e-3, atol=1e-3)
    assert jnp.allclose(rgb, rgb_ref, rtol=1e-3, atol=1e-3)

    # bf16 MXU operands (recommended default on v5e/v6e/v7x) + bf16 outputs,
    # f32 accumulation and f32 bias/LeakyReLU epilogue inside the kernel.
    fwd_bf16 = jax.jit(functools.partial(
        genconvblock_forward, scale=scale, paddings=paddings, leakiness=0.2,
        subtract_mean=True, compute_dtype=jnp.bfloat16, out_dtype=jnp.bfloat16))
    feat16, rgb16 = fwd_bf16(x, prevrgb, params)
    jax.block_until_ready((feat16, rgb16))
    assert jnp.allclose(feat16, feat_ref, rtol=5e-2, atol=5e-2)
    assert jnp.allclose(rgb16, rgb_ref, rtol=5e-2, atol=5e-2)

    print("KERNEL_OK")
</pallas_src>

<mosaic_0001>
module attributes {stable_mosaic.version = 11 : i64} {
  func.func @_genconv_fused_kernel(%arg0: i32, %arg1: memref<1x7x1280xf32, #tpu.memory_space<vmem>>, %arg2: memref<1x1280xf32, #tpu.memory_space<vmem>>, %arg3: memref<4x1280xf32, #tpu.memory_space<vmem>>, %arg4: memref<4x28xf32, #tpu.memory_space<vmem>>, %arg5: memref<4x1xf32, #tpu.memory_space<vmem>>, %arg6: memref<8x36xf32, #tpu.memory_space<vmem>>, %arg7: memref<8x1xf32, #tpu.memory_space<vmem>>, %arg8: memref<8x72xf32, #tpu.memory_space<vmem>>, %arg9: memref<8x1xf32, #tpu.memory_space<vmem>>, %arg10: memref<3x8xf32, #tpu.memory_space<vmem>>, %arg11: memref<3x1xf32, #tpu.memory_space<vmem>>, %arg12: memref<1x8x1280xf32, #tpu.memory_space<vmem>>, %arg13: memref<1x3x1280xf32, #tpu.memory_space<vmem>>) attributes {dimension_semantics = [#tpu.dimension_semantics<parallel>], iteration_bounds = array<i64: 2>, scalar_prefetch = 0 : i64, scratch_operands = 0 : i64, tpu.core_type = #tpu.core_type<tc>, window_params = [{transform_indices = @transform_0, window_bounds = array<i64: 1, 7, 1280>}, {pipeline_mode = #tpu.pipeline_mode<synchronous>, transform_indices = @transform_1, window_bounds = array<i64: 1, 1280>}, {pipeline_mode = #tpu.pipeline_mode<synchronous>, transform_indices = @transform_2, window_bounds = array<i64: 4, 1280>}, {pipeline_mode = #tpu.pipeline_mode<synchronous>, transform_indices = @transform_3, window_bounds = array<i64: 4, 28>}, {pipeline_mode = #tpu.pipeline_mode<synchronous>, transform_indices = @transform_4, window_bounds = array<i64: 4, 1>}, {pipeline_mode = #tpu.pipeline_mode<synchronous>, transform_indices = @transform_5, window_bounds = array<i64: 8, 36>}, {pipeline_mode = #tpu.pipeline_mode<synchronous>, transform_indices = @transform_6, window_bounds = array<i64: 8, 1>}, {pipeline_mode = #tpu.pipeline_mode<synchronous>, transform_indices = @transform_7, window_bounds = array<i64: 8, 72>}, {pipeline_mode = #tpu.pipeline_mode<synchronous>, transform_indices = @transform_8, window_bounds = array<i64: 8, 1>}, {pipeline_mode = #tpu.pipeline_mode<synchronous>, transform_indices = @transform_9, window_bounds = array<i64: 3, 8>}, {pipeline_mode = #tpu.pipeline_mode<synchronous>, transform_indices = @transform_10, window_bounds = array<i64: 3, 1>}, {transform_indices = @transform_11, window_bounds = array<i64: 1, 8, 1280>}, {transform_indices = @transform_12, window_bounds = array<i64: 1, 3, 1280>}]} {
    %c0 = arith.constant 0 : index
    %c0_0 = arith.constant 0 : index
    %0 = vector.load %arg2[%c0, %c0_0] : memref<1x1280xf32, #tpu.memory_space<vmem>>, vector<1x1280xf32>
    %c0_1 = arith.constant 0 : index
    %c0_2 = arith.constant 0 : index
    %c0_3 = arith.constant 0 : index
    %1 = vector.load %arg1[%c0_1, %c0_2, %c0_3] : memref<1x7x1280xf32, #tpu.memory_space<vmem>>, vector<1x7x1280xf32>
    %2 = vector.shape_cast %1 : vector<1x7x1280xf32> to vector<7x1280xf32>
    %c0_4 = arith.constant 0 : index
    %c0_5 = arith.constant 0 : index
    %3 = vector.load %arg3[%c0_4, %c0_5] : memref<4x1280xf32, #tpu.memory_space<vmem>>, vector<4x1280xf32>
    %4 = vector.extract_strided_slice %3 {offsets = [0, 0], sizes = [1, 1280], strides = [1, 1]} : vector<4x1280xf32> to vector<1x1280xf32>
    %5 = vector.broadcast %4 : vector<1x1280xf32> to vector<7x1280xf32>
    %6 = arith.mulf %2, %5 : vector<7x1280xf32>
    %7 = vector.extract_strided_slice %3 {offsets = [1, 0], sizes = [1, 1280], strides = [1, 1]} : vector<4x1280xf32> to vector<1x1280xf32>
    %8 = vector.broadcast %7 : vector<1x1280xf32> to vector<7x1280xf32>
    %9 = arith.mulf %2, %8 : vector<7x1280xf32>
    %10 = vector.extract_strided_slice %3 {offsets = [2, 0], sizes = [1, 1280], strides = [1, 1]} : vector<4x1280xf32> to vector<1x1280xf32>
    %11 = vector.broadcast %10 : vector<1x1280xf32> to vector<7x1280xf32>
    %12 = arith.mulf %2, %11 : vector<7x1280xf32>
    %13 = vector.extract_strided_slice %3 {offsets = [3, 0], sizes = [1, 1280], strides = [1, 1]} : vector<4x1280xf32> to vector<1x1280xf32>
    %14 = vector.broadcast %13 : vector<1x1280xf32> to vector<7x1280xf32>
    %15 = arith.mulf %2, %14 : vector<7x1280xf32>
    %16 = tpu.concatenate %6, %9, %12, %15 in 0 : vector<7x1280xf32>, vector<7x1280xf32>, vector<7x1280xf32>, vector<7x1280xf32> -> vector<28x1280xf32>
    %c0_6 = arith.constant 0 : index
    %c0_7 = arith.constant 0 : index
    %17 = vector.load %arg4[%c0_6, %c0_7] : memref<4x28xf32, #tpu.memory_space<vmem>>, vector<4x28xf32>
    %cst = arith.constant dense<0.000000e+00> : vector<4x1280xf32>
    %18 = tpu.matmul %17, %16, %cst {dimension_numbers = #tpu.dot_dimension_numbers<[1], [0], [0], [1], [0, 0, 1, 1], [], []>} : vector<4x28xf32>, vector<28x1280xf32>, vector<4x1280xf32> -> vector<4x1280xf32>
    %c0_8 = arith.constant 0 : index
    %c0_9 = arith.constant 0 : index
    %19 = vector.load %arg5[%c0_8, %c0_9] : memref<4x1xf32, #tpu.memory_space<vmem>>, vector<4x1xf32>
    %20 = vector.broadcast %19 : vector<4x1xf32> to vector<4x1280xf32>
    %21 = arith.addf %18, %20 : vector<4x1280xf32>
    %cst_10 = arith.constant 0.000000e+00 : f32
    %22 = vector.broadcast %cst_10 : f32 to vector<4x1280xf32>
    %23 = arith.cmpf oge, %21, %22 : vector<4x1280xf32>
    %cst_11 = arith.constant 2.000000e-01 : f32
    %24 = vector.broadcast %cst_11 : f32 to vector<4x1280xf32>
    %25 = arith.mulf %24, %21 : vector<4x1280xf32>
    %26 = arith.select %23, %21, %25 : vector<4x1280xi1>, vector<4x1280xf32>
    %27 = vector.shape_cast %0 : vector<1x1280xf32> to vector<1x1280xf32>
    %28 = vector.broadcast %27 : vector<1x1280xf32> to vector<4x1280xf32>
    %29 = arith.mulf %26, %28 : vector<4x1280xf32>
    %c34_i32 = arith.constant 34 : i32
    %30 = tpu.dynamic_rotate %29 by %c34_i32 dim 1 : vector<4x1280xf32>, i32 -> vector<4x1280xf32>
    %c1246_i32 = arith.constant 1246 : i32
    %31 = tpu.dynamic_rotate %29 by %c1246_i32 dim 1 : vector<4x1280xf32>, i32 -> vector<4x1280xf32>
    %c1_i32 = arith.constant 1 : i32
    %32 = tpu.dynamic_rotate %30 by %c1_i32 dim 1 : vector<4x1280xf32>, i32 -> vector<4x1280xf32>
    %c1279_i32 = arith.constant 1279 : i32
    %33 = tpu.dynamic_rotate %30 by %c1279_i32 dim 1 : vector<4x1280xf32>, i32 -> vector<4x1280xf32>
    %c1_i32_12 = arith.constant 1 : i32
    %34 = tpu.dynamic_rotate %29 by %c1_i32_12 dim 1 : vector<4x1280xf32>, i32 -> vector<4x1280xf32>
    %c1279_i32_13 = arith.constant 1279 : i32
    %35 = tpu.dynamic_rotate %29 by %c1279_i32_13 dim 1 : vector<4x1280xf32>, i32 -> vector<4x1280xf32>
    %c1_i32_14 = arith.constant 1 : i32
    %36 = tpu.dynamic_rotate %31 by %c1_i32_14 dim 1 : vector<4x1280xf32>, i32 -> vector<4x1280xf32>
    %c1279_i32_15 = arith.constant 1279 : i32
    %37 = tpu.dynamic_rotate %31 by %c1279_i32_15 dim 1 : vector<4x1280xf32>, i32 -> vector<4x1280xf32>
    %38 = tpu.concatenate %32, %30, %33, %34, %29, %35, %36, %31, %37 in 0 : vector<4x1280xf32>, vector<4x1280xf32>, vector<4x1280xf32>, vector<4x1280xf32>, vector<4x1280xf32>, vector<4x1280xf32>, vector<4x1280xf32>, vector<4x1280xf32>, vector<4x1280xf32> -> vector<36x1280xf32>
    %c0_16 = arith.constant 0 : index
    %c0_17 = arith.constant 0 : index
    %39 = vector.load %arg6[%c0_16, %c0_17] : memref<8x36xf32, #tpu.memory_space<vmem>>, vector<8x36xf32>
    %cst_18 = arith.constant dense<0.000000e+00> : vector<8x1280xf32>
    %40 = tpu.matmul %39, %38, %cst_18 {dimension_numbers = #tpu.dot_dimension_numbers<[1], [0], [0], [1], [0, 0, 1, 1], [], []>} : vector<8x36xf32>, vector<36x1280xf32>, vector<8x1280xf32> -> vector<8x1280xf32>
    %c0_19 = arith.constant 0 : index
    %c0_20 = arith.constant 0 : index
    %41 = vector.load %arg7[%c0_19, %c0_20] : memref<8x1xf32, #tpu.memory_space<vmem>>, vector<8x1xf32>
    %42 = vector.broadcast %41 : vector<8x1xf32> to vector<8x1280xf32>
    %43 = arith.addf %40, %42 : vector<8x1280xf32>
    %cst_21 = arith.constant 0.000000e+00 : f32
    %44 = vector.broadcast %cst_21 : f32 to vector<8x1280xf32>
    %45 = arith.cmpf oge, %43, %44 : vector<8x1280xf32>
    %cst_22 = arith.constant 2.000000e-01 : f32
    %46 = vector.broadcast %cst_22 : f32 to vector<8x1280xf32>
    %47 = arith.mulf %46, %43 : vector<8x1280xf32>
    %48 = arith.select %45, %43, %47 : vector<8x1280xi1>, vector<8x1280xf32>
    %49 = vector.shape_cast %0 : vector<1x1280xf32> to vector<1x1280xf32>
    %50 = vector.broadcast %49 : vector<1x1280xf32> to vector<8x1280xf32>
    %51 = arith.mulf %48, %50 : vector<8x1280xf32>
    %c34_i32_23 = arith.constant 34 : i32
    %52 = tpu.dynamic_rotate %51 by %c34_i32_23 dim 1 : vector<8x1280xf32>, i32 -> vector<8x1280xf32>
    %c1246_i32_24 = arith.constant 1246 : i32
    %53 = tpu.dynamic_rotate %51 by %c1246_i32_24 dim 1 : vector<8x1280xf32>, i32 -> vector<8x1280xf32>
    %c1_i32_25 = arith.constant 1 : i32
    %54 = tpu.dynamic_rotate %52 by %c1_i32_25 dim 1 : vector<8x1280xf32>, i32 -> vector<8x1280xf32>
    %c1279_i32_26 = arith.constant 1279 : i32
    %55 = tpu.dynamic_rotate %52 by %c1279_i32_26 dim 1 : vector<8x1280xf32>, i32 -> vector<8x1280xf32>
    %c1_i32_27 = arith.constant 1 : i32
    %56 = tpu.dynamic_rotate %51 by %c1_i32_27 dim 1 : vector<8x1280xf32>, i32 -> vector<8x1280xf32>
    %c1279_i32_28 = arith.constant 1279 : i32
    %57 = tpu.dynamic_rotate %51 by %c1279_i32_28 dim 1 : vector<8x1280xf32>, i32 -> vector<8x1280xf32>
    %c1_i32_29 = arith.constant 1 : i32
    %58 = tpu.dynamic_rotate %53 by %c1_i32_29 dim 1 : vector<8x1280xf32>, i32 -> vector<8x1280xf32>
    %c1279_i32_30 = arith.constant 1279 : i32
    %59 = tpu.dynamic_rotate %53 by %c1279_i32_30 dim 1 : vector<8x1280xf32>, i32 -> vector<8x1280xf32>
    %60 = tpu.concatenate %54, %52, %55, %56, %51, %57, %58, %53, %59 in 0 : vector<8x1280xf32>, vector<8x1280xf32>, vector<8x1280xf32>, vector<8x1280xf32>, vector<8x1280xf32>, vector<8x1280xf32>, vector<8x1280xf32>, vector<8x1280xf32>, vector<8x1280xf32> -> vector<72x1280xf32>
    %c0_31 = arith.constant 0 : index
    %c0_32 = arith.constant 0 : index
    %61 = vector.load %arg8[%c0_31, %c0_32] : memref<8x72xf32, #tpu.memory_space<vmem>>, vector<8x72xf32>
    %cst_33 = arith.constant dense<0.000000e+00> : vector<8x1280xf32>
    %62 = tpu.matmul %61, %60, %cst_33 {dimension_numbers = #tpu.dot_dimension_numbers<[1], [0], [0], [1], [0, 0, 1, 1], [], []>} : vector<8x72xf32>, vector<72x1280xf32>, vector<8x1280xf32> -> vector<8x1280xf32>
    %c0_34 = arith.constant 0 : index
    %c0_35 = arith.constant 0 : index
    %63 = vector.load %arg9[%c0_34, %c0_35] : memref<8x1xf32, #tpu.memory_space<vmem>>, vector<8x1xf32>
    %64 = vector.broadcast %63 : vector<8x1xf32> to vector<8x1280xf32>
    %65 = arith.addf %62, %64 : vector<8x1280xf32>
    %cst_36 = arith.constant 0.000000e+00 : f32
    %66 = vector.broadcast %cst_36 : f32 to vector<8x1280xf32>
    %67 = arith.cmpf oge, %65, %66 : vector<8x1280xf32>
    %cst_37 = arith.constant 2.000000e-01 : f32
    %68 = vector.broadcast %cst_37 : f32 to vector<8x1280xf32>
    %69 = arith.mulf %68, %65 : vector<8x1280xf32>
    %70 = arith.select %67, %65, %69 : vector<8x1280xi1>, vector<8x1280xf32>
    %71 = arith.mulf %70, %50 : vector<8x1280xf32>
    %c0_38 = arith.constant 0 : index
    %c0_39 = arith.constant 0 : index
    %c0_40 = arith.constant 0 : index
    %72 = vector.load %arg12[%c0_38, %c0_39, %c0_40] : memref<1x8x1280xf32, #tpu.memory_space<vmem>>, vector<1x8x1280xf32>
    %73 = vector.shape_cast %72 : vector<1x8x1280xf32> to vector<8x1280xf32>
    %74 = vector.shape_cast %71 : vector<8x1280xf32> to vector<1x8x1280xf32>
    tpu.vector_store %arg12[%c0_38, %c0_39, %c0_40], %74 {strides = array<i32>} : memref<1x8x1280xf32, #tpu.memory_space<vmem>>, vector<1x8x1280xf32>,
    %c0_41 = arith.constant 0 : index
    %c0_42 = arith.constant 0 : index
    %75 = vector.load %arg10[%c0_41, %c0_42] : memref<3x8xf32, #tpu.memory_space<vmem>>, vector<3x8xf32>
    %cst_43 = arith.constant dense<0.000000e+00> : vector<3x1280xf32>
    %76 = tpu.matmul %75, %71, %cst_43 {dimension_numbers = #tpu.dot_dimension_numbers<[1], [0], [0], [1], [0, 0, 1, 1], [], []>} : vector<3x8xf32>, vector<8x1280xf32>, vector<3x1280xf32> -> vector<3x1280xf32>
    %c0_44 = arith.constant 0 : index
    %c0_45 = arith.constant 0 : index
    %77 = vector.load %arg11[%c0_44, %c0_45] : memref<3x1xf32, #tpu.memory_space<vmem>>, vector<3x1xf32>
    %78 = vector.broadcast %77 : vector<3x1xf32> to vector<3x1280xf32>
    %79 = arith.addf %76, %78 : vector<3x1280xf32>
    %c0_46 = arith.constant 0 : index
    %c0_47 = arith.constant 0 : index
    %c0_48 = arith.constant 0 : index
    %80 = vector.load %arg13[%c0_46, %c0_47, %c0_48] : memref<1x3x1280xf32, #tpu.memory_space<vmem>>, vector<1x3x1280xf32>
    %81 = vector.shape_cast %80 : vector<1x3x1280xf32> to vector<3x1280xf32>
    %82 = vector.shape_cast %79 : vector<3x1280xf32> to vector<1x3x1280xf32>
    tpu.vector_store %arg13[%c0_46, %c0_47, %c0_48], %82 {strides = array<i32>} : memref<1x3x1280xf32, #tpu.memory_space<vmem>>, vector<1x3x1280xf32>,
    return
  }
  func.func @transform_0(%arg0: i32) -> (i32, i32, i32) {
    %c0_i32 = arith.constant 0 : i32
    %c0_i32_0 = arith.constant 0 : i32
    %c0_i32_1 = arith.constant 0 : i32
    return %arg0, %c0_i32, %c0_i32_0 : i32, i32, i32
  }
  func.func @transform_1(%arg0: i32) -> (i32, i32) {
    %c0_i32 = arith.constant 0 : i32
    %c0_i32_0 = arith.constant 0 : i32
    %c0_i32_1 = arith.constant 0 : i32
    return %c0_i32, %c0_i32_0 : i32, i32
  }
  func.func @transform_2(%arg0: i32) -> (i32, i32) {
    %c0_i32 = arith.constant 0 : i32
    %c0_i32_0 = arith.constant 0 : i32
    %c0_i32_1 = arith.constant 0 : i32
    return %c0_i32, %c0_i32_0 : i32, i32
  }
  func.func @transform_3(%arg0: i32) -> (i32, i32) {
    %c0_i32 = arith.constant 0 : i32
    %c0_i32_0 = arith.constant 0 : i32
    %c0_i32_1 = arith.constant 0 : i32
    return %c0_i32, %c0_i32_0 : i32, i32
  }
  func.func @transform_4(%arg0: i32) -> (i32, i32) {
    %c0_i32 = arith.constant 0 : i32
    %c0_i32_0 = arith.constant 0 : i32
    %c0_i32_1 = arith.constant 0 : i32
    return %c0_i32, %c0_i32_0 : i32, i32
  }
  func.func @transform_5(%arg0: i32) -> (i32, i32) {
    %c0_i32 = arith.constant 0 : i32
    %c0_i32_0 = arith.constant 0 : i32
    %c0_i32_1 = arith.constant 0 : i32
    return %c0_i32, %c0_i32_0 : i32, i32
  }
  func.func @transform_6(%arg0: i32) -> (i32, i32) {
    %c0_i32 = arith.constant 0 : i32
    %c0_i32_0 = arith.constant 0 : i32
    %c0_i32_1 = arith.constant 0 : i32
    return %c0_i32, %c0_i32_0 : i32, i32
  }
  func.func @transform_7(%arg0: i32) -> (i32, i32) {
    %c0_i32 = arith.constant 0 : i32
    %c0_i32_0 = arith.constant 0 : i32
    %c0_i32_1 = arith.constant 0 : i32
    return %c0_i32, %c0_i32_0 : i32, i32
  }
  func.func @transform_8(%arg0: i32) -> (i32, i32) {
    %c0_i32 = arith.constant 0 : i32
    %c0_i32_0 = arith.constant 0 : i32
    %c0_i32_1 = arith.constant 0 : i32
    return %c0_i32, %c0_i32_0 : i32, i32
  }
  func.func @transform_9(%arg0: i32) -> (i32, i32) {
    %c0_i32 = arith.constant 0 : i32
    %c0_i32_0 = arith.constant 0 : i32
    %c0_i32_1 = arith.constant 0 : i32
    return %c0_i32, %c0_i32_0 : i32, i32
  }
  func.func @transform_10(%arg0: i32) -> (i32, i32) {
    %c0_i32 = arith.constant 0 : i32
    %c0_i32_0 = arith.constant 0 : i32
    %c0_i32_1 = arith.constant 0 : i32
    return %c0_i32, %c0_i32_0 : i32, i32
  }
  func.func @transform_11(%arg0: i32) -> (i32, i32, i32) {
    %c0_i32 = arith.constant 0 : i32
    %c0_i32_0 = arith.constant 0 : i32
    %c0_i32_1 = arith.constant 0 : i32
    return %arg0, %c0_i32, %c0_i32_0 : i32, i32, i32
  }
  func.func @transform_12(%arg0: i32) -> (i32, i32, i32) {
    %c0_i32 = arith.constant 0 : i32
    %c0_i32_0 = arith.constant 0 : i32
    %c0_i32_1 = arith.constant 0 : i32
    return %arg0, %c0_i32, %c0_i32_0 : i32, i32, i32
  }
}

</mosaic_0001>

<bundles_post_ra>
// kernel: genconvblock_forward.1
= control target key start
LH: loop header
LB: loop body
LE: loop exit
PB: predicated region body
PF: predicated region fallthrough
CT: control target
= control target key end

     0   :  { %s3044_s21 = smov 0   ;;  %s4598_s0 = inlined_call_operand.vmem [shape: f32[2,7,1280], index: 0, kind: input, shape index: {}]   ;;  %s4599_s1 = inlined_call_operand.vmem [shape: f32[1,1280], index: 1, kind: input, shape index: {}]   ;;  %s4600_s2 = inlined_call_operand.vmem [shape: f32[4,1280], index: 2, kind: input, shape index: {}]   ;;  %s4601_s3 = inlined_call_operand.vmem [shape: f32[4,28], index: 3, kind: input, shape index: {}]   ;;  %s4602_s4 = inlined_call_operand.vmem [shape: f32[4,1], index: 4, kind: input, shape index: {}]   ;;  %s4603_s5 = inlined_call_operand.vmem [shape: f32[8,36], index: 5, kind: input, shape index: {}]   ;;  %s4604_s6 = inlined_call_operand.vmem [shape: f32[8,1], index: 6, kind: input, shape index: {}]   ;;  %s4605_s7 = inlined_call_operand.vmem [shape: f32[8,72], index: 7, kind: input, shape index: {}]   ;;  %s4606_s8 = inlined_call_operand.vmem [shape: f32[8,1], index: 8, kind: input, shape index: {}]   ;;  %s4607_s9 = inlined_call_operand.vmem [shape: f32[3,8], index: 9, kind: input, shape index: {}]   ;;  %s4608_s10 = inlined_call_operand.vmem [shape: f32[3,1], index: 10, kind: input, shape index: {}]   ;;  %s4609_s11 = inlined_call_operand.vmem [shape: f32[2,8,1280], index: 11, kind: output, shape index: {0}]   ;;  %s4610_s12 = inlined_call_operand.vmem [shape: f32[2,3,1280], index: 12, kind: output, shape index: {1}]  }
   0x1 LB: > { %s2543_s22 = sadd.s32 4294967295, %s2972_s21   ;;  %p2547_p0 = scmp.ge.s32.totalorder %s2972_s21, 1  ;;  %s2972_s21 = sphi %s3044_s21, %s23_s21  }
   0x2   : > { %p365_p1 = scmp.lt.s32.totalorder %s2972_s21, 3 }
   0x4   : > { %p366_p2 = pnand %p2547_p0, %p365_p1 }
   0x6   : > { %369 = sbr.rel (%p366_p2) target bundleno = 1228 (0x4cc), region = 64 }
   0xb   : > { %p412_p3 = scmp.lt.s32.totalorder %s2543_s22, 1  ;;  %v3055_v0 = vld [vmem:[%s4600_s2] sm:$0xff]  ;;  %v3060_v1 = vld [vmem:[%s4600_s2 + $0x8] sm:$0xff]  ;;  %vm743_vm0 = vcmask 1043456   ;;  %vm721_vm1 = vcmask 1044480   ;;  %vm710_vm2 = vcmask 1045504  }
   0xc   : > { %v569_v2 = vperm.slane %v3055_v0, 3  ;;  %v570_v3 = vperm.slane %v3055_v0, 7  ;;  %v571_v4 = vperm.slane %v3060_v1, 3  ;;  %v572_v5 = vperm.slane %v3060_v1, 7  ;;  %s2975_s28 = smov 94   ;;  %s2976_s29 = smov 127  }
   0xd   : > { %s4711_s22 = smov (!%p412_p3, %s2543_s22), 1  ;;  %v529_v6 = vperm.slane %v3055_v0, 2  ;;  %v530_v7 = vperm.slane %v3055_v0, 6  ;;  %v531_v8 = vperm.slane %v3060_v1, 2  ;;  %v532_v9 = vperm.slane %v3060_v1, 6  ;;  %s2978_s15 = smov 1  }
   0xe   : > { %v589_v10 = vperm.slane %v569_v2, 3  ;;  %v590_v11 = vperm.slane %v570_v3, 3  ;;  %v591_v12 = vperm.slane %v571_v4, 3  ;;  %s2613_s27 = smul.u32 80, %s4711_s22  ;;  %v592_v13 = vperm.slane %v572_v5, 3 }
   0xf   : > { %v549_v14 = vperm.slane %v529_v6, 2  ;;  %v550_v15 = vperm.slane %v530_v7, 2  ;;  %v551_v16 = vperm.slane %v531_v8, 2  ;;  %v552_v17 = vperm.slane %v532_v9, 2  ;;  %v3103_v6 = vld [vmem:[%s4600_s2 + $0x10] sm:$0xff]  ;;  %v3108_v7 = vld [vmem:[%s4600_s2 + $0x18] sm:$0xff] }
  0x10   : > { %v489_v18 = vperm.slane %v3055_v0, 1  ;;  %v490_v19 = vperm.slane %v3055_v0, 5  ;;  %v491_v20 = vperm.slane %v3060_v1, 1  ;;  %s3081_s30 = scalar_lea.vmem %s4598_s0, %s2613_s27  ;;  %v492_v21 = vperm.slane %v3060_v1, 5  ;;  %s4523_s13 = scalar_lea.vmem %s4609_s11, %s2613_s27 }
  0x11   : > { %v449_v22 = vperm.slane %v3055_v0, 0  ;;  %v450_v23 = vperm.slane %v3055_v0, 4  ;;  %v451_v24 = vperm.slane %v3060_v1, 0  ;;  %v429_v25 = vld [vmem:[%s3081_s30] sm:$0x7f]  ;;  %vm699_vm3 = vcmask 1046528  }
  0x12   : > { %v430_v26 = vld [vmem:[%s3081_s30 + $0x8] sm:$0x7f]  ;;  %v431_v27 = vld [vmem:[%s3081_s30 + $0x10] sm:$0x7f]  ;;  %v599_v28 = vmul.f32 %v589_v10, %v429_v25  ;;  %v432_v31 = vld [vmem:[%s3081_s30 + $0x18] sm:$0x7f]  ;;  %v559_v32 = vmul.f32 %v549_v14, %v429_v25 }
  0x13   : > { %v600_v29 = vmul.f32 %v590_v11, %v430_v26  ;;  %v601_v30 = vmul.f32 %v591_v12, %v431_v27  ;;  %v602_v33 = vmul.f32 %v592_v13, %v432_v31  ;;  %v560_v34 = vmul.f32 %v550_v15, %v430_v26  ;;  %v3120_v14 = vld [vmem:[%s4601_s3] sm:$0xf]  ;;  %s2614_s27 = smul.u32 40, %s4711_s22 }
  0x14   : > { %v561_v35 = vmul.f32 %v551_v16, %v431_v27  ;;  %v562_v36 = vmul.f32 %v552_v17, %v432_v31  ;;  %v679_v37 = vrot.slane %v599_v28, 3  ;;  %v649_v40 = vrot.slane %v559_v32, 2  ;;  %v3123_v15 = vld [vmem:[%s3081_s30 + $0x20] sm:$0x7f] }
  0x15   : > { %v680_v38 = vrot.slane %v600_v29, 3  ;;  %v681_v39 = vrot.slane %v601_v30, 3  ;;  %v682_v41 = vrot.slane %v602_v33, 3  ;;  %v650_v42 = vrot.slane %v560_v34, 2  ;;  %v3142_v30 = vld [vmem:[%s3081_s30 + $0x38] sm:$0x7f]  ;;  %s4583_s18 = scalar_lea.vmem %s4610_s12, %s2614_s27 }
  0x16   : > { %v651_v43 = vrot.slane %v561_v35, 2  ;;  %v652_v44 = vrot.slane %v562_v36, 2  ;;  %2551 = vmatpush.msk.msra.mxu0 %vm743_vm0, %v679_v37  ;;  %v722_v45 = vsel %vm721_vm1, %v649_v40, %v679_v37  ;;  %v509_v46 = vperm.slane %v489_v18, 1  ;;  %v3127_v18 = vld [vmem:[%s3081_s30 + $0x28] sm:$0x7f] }
  0x17   : > { %2553 = vmatpush.msk.msra.mxu1 %vm743_vm0, %v680_v38  ;;  %v510_v47 = vperm.slane %v490_v19, 1  ;;  %v511_v48 = vperm.slane %v491_v20, 1  ;;  %2555 = vmatpush.msk.msra.mxu2 %vm743_vm0, %v681_v39  ;;  %v723_v49 = vsel %vm721_vm1, %v650_v42, %v680_v38  ;;  %v512_v52 = vperm.slane %v492_v21, 1  ;;  %v3132_v21 = vld [vmem:[%s3081_s30 + $0x30] sm:$0x7f] }
  0x18   : > { %2557 = vmatpush.msk.msra.mxu3 %vm743_vm0, %v682_v41  ;;  %v724_v50 = vsel %vm721_vm1, %v651_v43, %v681_v39  ;;  %v725_v51 = vsel %vm721_vm1, %v652_v44, %v682_v41  ;;  %777 = vmatpush.msra.mxu0 %v722_v45  ;;  %v519_v53 = vmul.f32 %v509_v46, %v429_v25  ;;  %v469_v56 = vperm.slane %v449_v22, 0 }
  0x19   : > { %797 = vmatpush.msra.mxu1 %v723_v49  ;;  %v520_v54 = vmul.f32 %v510_v47, %v430_v26  ;;  %v521_v55 = vmul.f32 %v511_v48, %v431_v27  ;;  %817 = vmatpush.msra.mxu2 %v724_v50  ;;  %v522_v57 = vmul.f32 %v512_v52, %v432_v31  ;;  %v470_v58 = vperm.slane %v450_v23, 0 }
  0x1a   : > { %837 = vmatpush.msra.mxu3 %v725_v51  ;;  %v471_v59 = vperm.slane %v451_v24, 0  ;;  %v452_v60 = vperm.slane %v3060_v1, 4  ;;  %v619_v61 = vrot.slane %v519_v53, 1  ;;  %v479_v0 = vmul.f32 %v469_v56, %v429_v25 }
  0x1b   : > { %v620_v62 = vrot.slane %v520_v54, 1  ;;  %v621_v63 = vrot.slane %v521_v55, 1  ;;  %v622_v2 = vrot.slane %v522_v57, 1  ;;  %v480_v3 = vmul.f32 %v470_v58, %v430_v26 }
  0x1c   : > { %v481_v4 = vmul.f32 %v471_v59, %v431_v27  ;;  %v472_v5 = vperm.slane %v452_v60, 0  ;;  %v711_v1 = vsel %vm710_vm2, %v619_v61, %v649_v40  ;;  %v700_v10 = vsel %vm699_vm3, %v479_v0, %v619_v61 }
  0x1d   : > { %v712_v8 = vsel %vm710_vm2, %v620_v62, %v650_v42  ;;  %v713_v9 = vsel %vm710_vm2, %v621_v63, %v651_v43  ;;  %778 = vmatpush.msra.mxu0 %v711_v1  ;;  %v714_v11 = vsel %vm710_vm2, %v622_v2, %v652_v44  ;;  %v701_v12 = vsel %vm699_vm3, %v480_v3, %v620_v62 }
  0x1e   : > { %798 = vmatpush.msra.mxu1 %v712_v8  ;;  %v702_v13 = vsel %vm699_vm3, %v481_v4, %v621_v63  ;;  %vm739_vm4 = vcmask 228352   ;;  %818 = vmatpush.msra.mxu2 %v713_v9  ;;  %v482_v16 = vmul.f32 %v472_v5, %v432_v31  ;;  %v573_v17 = vperm.slane %v3103_v6, 3 }
  0x1f   : > { %838 = vmatpush.msra.mxu3 %v714_v11  ;;  %v574_v19 = vperm.slane %v3103_v6, 7  ;;  %v575_v20 = vperm.slane %v3108_v7, 3  ;;  %779 = vmatpush.msra.mxu0 %v700_v10  ;;  %v576_v22 = vperm.slane %v3108_v7, 7  ;;  %v533_v23 = vperm.slane %v3103_v6, 2 }
  0x20   : > { %799 = vmatpush.msra.mxu1 %v701_v12  ;;  %v534_v24 = vperm.slane %v3103_v6, 6  ;;  %v535_v25 = vperm.slane %v3108_v7, 2  ;;  %819 = vmatpush.msra.mxu2 %v702_v13  ;;  %v703_v26 = vsel %vm699_vm3, %v482_v16, %v622_v2  ;;  %v593_v27 = vperm.slane %v573_v17, 3 }
  0x21   : > { %2552 = vmatmul.msk.f32.vlgmr.msra.gmra.mxu0 %vm739_vm4, %v3120_v14  ;;  %v594_v28 = vperm.slane %v574_v19, 3  ;;  %v595_v29 = vperm.slane %v575_v20, 3  ;;  %839 = vmatpush.msra.mxu3 %v703_v26  ;;  %v596_v31 = vperm.slane %v576_v22, 3  ;;  %v553_v32 = vperm.slane %v533_v23, 2  ;;  %v443_v19 = vld [vmem:[%s4600_s2 + $0x20] sm:$0xff] }
  0x22   : > { %2554 = vmatmul.msk.f32.vlgmr.msra.gmra.mxu1 %vm739_vm4, %v3120_v14  ;;  %v554_v33 = vperm.slane %v534_v24, 2  ;;  %v555_v34 = vperm.slane %v535_v25, 2  ;;  %2556 = vmatmul.msk.f32.vlgmr.msra.gmra.mxu2 %vm739_vm4, %v3120_v14  ;;  %v603_v35 = vmul.f32 %v593_v27, %v3123_v15  ;;  %v536_v38 = vperm.slane %v3108_v7, 6 }
  0x23   : > { %2558 = vmatmul.msk.f32.vlgmr.msra.gmra.mxu3 %vm739_vm4, %v3120_v14  ;;  %v604_v36 = vmul.f32 %v594_v28, %v3127_v18  ;;  %v605_v37 = vmul.f32 %v595_v29, %v3132_v21  ;;  %v606_v39 = vmul.f32 %v596_v31, %v3142_v30  ;;  %v563_v40 = vmul.f32 %v553_v32, %v3123_v15  ;;  %v437_v32 = vld [vmem:[%s3081_s30 + $0x40] sm:$0x7f] }
  0x24   : > { %v564_v41 = vmul.f32 %v554_v33, %v3127_v18  ;;  %v565_v42 = vmul.f32 %v555_v34, %v3132_v21  ;;  %v683_v43 = vrot.slane %v603_v35, 3  ;;  %v556_v46 = vperm.slane %v536_v38, 2  ;;  %v438_v35 = vld [vmem:[%s3081_s30 + $0x48] sm:$0x7f]  ;;  %s2977_s30 = smov 34  }
  0x25   : > { %v684_v44 = vrot.slane %v604_v36, 3  ;;  %v685_v45 = vrot.slane %v605_v37, 3  ;;  %v686_v47 = vrot.slane %v606_v39, 3  ;;  %v653_v48 = vrot.slane %v563_v40, 2 }
  0x26   : > { %v654_v49 = vrot.slane %v564_v41, 2  ;;  %v655_v50 = vrot.slane %v565_v42, 2  ;;  %2559 = vmatpush.msk.msrb.mxu0 %vm743_vm0, %v683_v43  ;;  %v566_v51 = vmul.f32 %v556_v46, %v3142_v30  ;;  %v493_v52 = vperm.slane %v3103_v6, 1 }
  0x27   : > { %2561 = vmatpush.msk.msrb.mxu1 %vm743_vm0, %v684_v44  ;;  %v494_v53 = vperm.slane %v3103_v6, 5  ;;  %v495_v54 = vperm.slane %v3108_v7, 1  ;;  %2563 = vmatpush.msk.msrb.mxu2 %vm743_vm0, %v685_v45  ;;  %v726_v55 = vsel %vm721_vm1, %v653_v48, %v683_v43  ;;  %v496_v58 = vperm.slane %v3108_v7, 5  ;;  %v733_v43 = vld [vmem:[%s4602_s4] sm:$0xf] }
  0x28   : > { %2565 = vmatpush.msk.msrb.mxu3 %vm743_vm0, %v686_v47  ;;  %v727_v56 = vsel %vm721_vm1, %v654_v49, %v684_v44  ;;  %v728_v57 = vsel %vm721_vm1, %v655_v50, %v685_v45  ;;  %857 = vmatpush.msrb.mxu0 %v726_v55  ;;  %v656_v59 = vrot.slane %v566_v51, 2  ;;  %v513_v60 = vperm.slane %v493_v52, 1 }
  0x29   : > { %877 = vmatpush.msrb.mxu1 %v727_v56  ;;  %v514_v61 = vperm.slane %v494_v53, 1  ;;  %v515_v62 = vperm.slane %v495_v54, 1  ;;  %897 = vmatpush.msrb.mxu2 %v728_v57  ;;  %v516_v63 = vperm.slane %v496_v58, 1  ;;  %v453_v0 = vperm.slane %v3103_v6, 0 }
  0x2a   : > { %v454_v2 = vperm.slane %v3103_v6, 4  ;;  %v455_v3 = vperm.slane %v3108_v7, 0  ;;  %v729_v4 = vsel %vm721_vm1, %v656_v59, %v686_v47  ;;  %v523_v5 = vmul.f32 %v513_v60, %v3123_v15 }
  0x2b   : > { %v524_v1 = vmul.f32 %v514_v61, %v3127_v18  ;;  %v525_v8 = vmul.f32 %v515_v62, %v3132_v21  ;;  %917 = vmatpush.msrb.mxu3 %v729_v4  ;;  %v526_v9 = vmul.f32 %v516_v63, %v3142_v30  ;;  %v473_v10 = vperm.slane %v453_v0, 0 }
  0x2c   : > { %v474_v11 = vperm.slane %v454_v2, 0  ;;  %v475_v12 = vperm.slane %v455_v3, 0  ;;  %v623_v13 = vrot.slane %v523_v5, 1  ;;  %v456_v6 = vperm.slane %v3108_v7, 4 }
  0x2d   : > { %v624_v16 = vrot.slane %v524_v1, 1  ;;  %v625_v17 = vrot.slane %v525_v8, 1  ;;  %v626_v20 = vrot.slane %v526_v9, 1  ;;  %v483_v22 = vmul.f32 %v473_v10, %v3123_v15 }
  0x2e   : > { %v484_v23 = vmul.f32 %v474_v11, %v3127_v18  ;;  %v485_v24 = vmul.f32 %v475_v12, %v3132_v21  ;;  %v715_v25 = vsel %vm710_vm2, %v623_v13, %v653_v48  ;;  %v476_v28 = vperm.slane %v456_v6, 0  ;;  %v3222_v12 = vld [vmem:[%s4599_s1] sm:$0xff] }
  0x2f   : > { %v716_v26 = vsel %vm710_vm2, %v624_v16, %v654_v49  ;;  %v717_v27 = vsel %vm710_vm2, %v625_v17, %v655_v50  ;;  %858 = vmatpush.msrb.mxu0 %v715_v25  ;;  %v718_v7 = vsel %vm710_vm2, %v626_v20, %v656_v59  ;;  %v704_v29 = vsel %vm699_vm3, %v483_v22, %v623_v13 }
  0x30   : > { %878 = vmatpush.msrb.mxu1 %v716_v26  ;;  %v705_v15 = vsel %vm699_vm3, %v484_v23, %v624_v16  ;;  %v577_v18 = vperm.slane %v443_v19, 3  ;;  %898 = vmatpush.msrb.mxu2 %v717_v27  ;;  %v706_v21 = vsel %vm699_vm3, %v485_v24, %v625_v17  ;;  %v486_v31 = vmul.f32 %v476_v28, %v3142_v30 }
  0x31   : > { %918 = vmatpush.msrb.mxu3 %v718_v7  ;;  %v578_v33 = vperm.slane %v443_v19, 7  ;;  %859 = vmatpush.msrb.mxu0 %v704_v29  ;;  %v537_v36 = vperm.slane %v443_v19, 2  ;;  %v538_v37 = vperm.slane %v443_v19, 6  ;;  %v497_v38 = vperm.slane %v443_v19, 1 }
  0x32   : > { %879 = vmatpush.msrb.mxu1 %v705_v15  ;;  %v597_v34 = vperm.slane %v577_v18, 3  ;;  %899 = vmatpush.msrb.mxu2 %v706_v21  ;;  %v707_v39 = vsel %vm699_vm3, %v486_v31, %v626_v20  ;;  %v498_v41 = vperm.slane %v443_v19, 5  ;;  %v457_v42 = vperm.slane %v443_v19, 0 }
  0x33   : > { %2560 = vmatmul.msk.f32.vlgmr.msrb.gmra.mxu0 %vm739_vm4, %v3120_v14  ;;  %v598_v40 = vperm.slane %v578_v33, 3  ;;  %919 = vmatpush.msrb.mxu3 %v707_v39  ;;  %v557_v44 = vperm.slane %v537_v36, 2  ;;  %v558_v45 = vperm.slane %v538_v37, 2  ;;  %v517_v46 = vperm.slane %v497_v38, 1 }
  0x34   : > { %2562 = vmatmul.msk.f32.vlgmr.msrb.gmra.mxu1 %vm739_vm4, %v3120_v14  ;;  %v607_v30 = vmul.f32 %v597_v34, %v437_v32  ;;  %2564 = vmatmul.msk.f32.vlgmr.msrb.gmra.mxu2 %vm739_vm4, %v3120_v14  ;;  %v518_v48 = vperm.slane %v498_v41, 1  ;;  %v477_v49 = vperm.slane %v457_v42, 0  ;;  %v458_v50 = vperm.slane %v443_v19, 4 }
  0x35   : > { %2566 = vmatmul.msk.f32.vlgmr.msrb.gmra.mxu3 %vm739_vm4, %v3120_v14  ;;  %v608_v47 = vmul.f32 %v598_v40, %v438_v35  ;;  %v2974_v52 = vmov 0   ;;  %v567_v53 = vmul.f32 %v557_v44, %v437_v32  ;;  %v568_v54 = vmul.f32 %v558_v45, %v438_v35 }
  0x36   : > { %v687_v51 = vrot.slane %v607_v30, 3  ;;  %2628 = vset.pattern.permute.xlu0 %v2974_v52  ;;  %v527_v55 = vmul.f32 %v517_v46, %v437_v32  ;;  %2774 = vset.pattern.permute.xlu1 %v2974_v52  ;;  %v528_v57 = vmul.f32 %v518_v48, %v438_v35  ;;  %v478_v58 = vperm.slane %v458_v50, 0 }
  0x37   : > { %v688_v56 = vrot.slane %v608_v47, 3  ;;  %736 = vperm.xlu0 %2628, %v733_v43   ;;  %2965 = vset.pattern.permute.xlu2 %v2974_v52  ;;  %v657_v59 = vrot.slane %v567_v53, 2  ;;  %v658_v60 = vrot.slane %v568_v54, 2  ;;  %v487_v62 = vmul.f32 %v477_v49, %v437_v32  ;;  %v428_v43 = vld [vmem:[%s4599_s1 + $0x8] sm:$0x3] }
  0x38   : > { %2567 = vmatpush.msk.msra.mxu0 %vm743_vm0, %v687_v51  ;;  %v627_v61 = vrot.slane %v527_v55, 1  ;;  %v628_v63 = vrot.slane %v528_v57, 1  ;;  %v488_v0 = vmul.f32 %v478_v58, %v438_v35  ;;  %v3230_v20 = vperm.slane %v3222_v12, 0 }
  0x39   : > { %2569 = vmatpush.msk.msra.mxu1 %vm743_vm0, %v688_v56  ;;  %v730_v2 = vsel %vm721_vm1, %v657_v59, %v687_v51  ;;  %v731_v3 = vsel %vm721_vm1, %v658_v60, %v688_v56  ;;  %v3236_v22 = vperm.slane %v3222_v12, 2  ;;  %v3255_v33 = vperm.slane %v3222_v12, 3 }
  0x3a   : > { %v719_v4 = vsel %vm710_vm2, %v627_v61, %v657_v59  ;;  %937 = vmatpush.msra.mxu0 %v730_v2  ;;  %v720_v5 = vsel %vm710_vm2, %v628_v63, %v658_v60  ;;  %v708_v1 = vsel %vm699_vm3, %v487_v62, %v627_v61  ;;  %v709_v8 = vsel %vm699_vm3, %v488_v0, %v628_v63 }
  0x3b   : > { %957 = vmatpush.msra.mxu1 %v731_v3  ;;  %4650 = vst [vmem:[#allocation2_spill] sm:$0xff] %v3230_v20  ;;  %v3270_v30 = vperm.slane %v3222_v12, 6  ;;  %v3278_v46 = vperm.slane %v3222_v12, 7  ;;  %v3281_v52 = vperm.slane %v428_v43, 1  ;;  %v3294_v58 = vperm.slane %v3222_v12, 5 }
  0x3c   : > { %938 = vmatpush.msra.mxu0 %v719_v4  ;;  %4652 = vst [vmem:[#allocation4_spill] sm:$0xff] %v3236_v22  ;;  %v3305_v3 = vperm.slane %v428_v43, 0 }
  0x3d   : > { %958 = vmatpush.msra.mxu1 %v720_v5  ;;  %4653 = vst [vmem:[#allocation5_spill] sm:$0xff] %v3255_v33 }
  0x3e   : > { %939 = vmatpush.msra.mxu0 %v708_v1  ;;  %4654 = vst [vmem:[#allocation6_spill] sm:$0xff] %v3270_v30 }
  0x3f   : > { %959 = vmatpush.msra.mxu1 %v709_v8  ;;  %2568 = vmatmul.msk.f32.vlgmr.msra.gmra.mxu0 %vm739_vm4, %v3120_v14  ;;  %4655 = vst [vmem:[#allocation7_spill] sm:$0xff] %v3278_v46  ;;  %v3312_v8 = vperm.slane %v3222_v12, 4 }
  0x40   : > { %2570 = vmatmul.msk.f32.vlgmr.msra.gmra.mxu1 %vm739_vm4, %v3120_v14  ;;  %v3233_v14 = vperm.slane %v3222_v12, 1  ;;  %4656 = vst [vmem:[#allocation8_spill] sm:$0xff] %v3281_v52  ;;  %vm1439_vm4 = vcmask 293888  }
  0x41   : > { %4659 = vst [vmem:[#allocation11_spill] sm:$0xff] %v3294_v58 }
  0x42   : > { %4651 = vst [vmem:[#allocation3_spill] sm:$0xff] %v3233_v14 }
  0x43   : > { %4660 = vst [vmem:[#allocation12_spill] sm:$0xff] %v3305_v3 }
  0x44   : > { %4661 = vst [vmem:[#allocation13_spill] sm:$0xff] %v3312_v8 }
  0x9e   : > { %v781_v9 = vpop.f32.mrf.mxu0 }
  0x9f   : > { %v801_v10 = vpop.f32.mrf.mxu1 }
  0xa5   : > { %v821_v11 = vpop.f32.mrf.mxu2 }
  0xa6   : > { %v841_v19 = vpop.f32.mrf.mxu3 }
  0xa9   : > { %v3224_v13 = vpop.permute.xlu0 %736 }
  0xaa   : > { %v782_v16 = vadd.f32 %v781_v9, %v3224_v13  ;;  %v802_v17 = vadd.f32 %v801_v10, %v3224_v13  ;;  %v822_v6 = vadd.f32 %v821_v11, %v3224_v13  ;;  %v842_v26 = vadd.f32 %v841_v19, %v3224_v13 }
  0xab   : > { %v1046_v19 = vlaneseq }
  0xac   : > { %vm964_vm5 = vcmp.ge.f32.partialorder %v782_v16, 0.0  ;;  %v974_v23 = vmul.f32 0.2, %v782_v16  ;;  %vm965_vm6 = vcmp.ge.f32.partialorder %v802_v17, 0.0  ;;  %v975_v24 = vmul.f32 0.2, %v802_v17 }
  0xad   : > { %vm966_vm7 = vcmp.ge.f32.partialorder %v822_v6, 0.0  ;;  %v976_v25 = vmul.f32 0.2, %v822_v6  ;;  %v977_v21 = vmul.f32 0.2, %v842_v26  ;;  %vm967_vm8 = vcmp.ge.f32.partialorder %v842_v26, 0.0 }
  0xae   : > { %v984_v27 = vsel %vm964_vm5, %v782_v16, %v974_v23  ;;  %v985_v28 = vsel %vm965_vm6, %v802_v17, %v975_v24  ;;  %v3343_v23 = vand.u32 127, %v1046_v19 }
  0xaf   : > { %v3240_v7 = vmul.f32 %v3230_v20, %v984_v27  ;;  %v3243_v29 = vmul.f32 %v3233_v14, %v985_v28  ;;  %v986_v15 = vsel %vm966_vm7, %v822_v6, %v976_v25  ;;  %v987_v34 = vsel %vm967_vm8, %v842_v26, %v977_v21 }
  0xb0   : > { %v3246_v18 = vmul.f32 %v3236_v22, %v986_v15  ;;  %v861_v32 = vpop.f32.mrf.mxu0  ;;  %v3262_v37 = vmul.f32 %v3255_v33, %v987_v34  ;;  %vm1048_vm15 = vcmp.lt.s32.totalorder %v3343_v23, 34  ;;  %vm1079_vm1 = vcmp.lt.s32.totalorder %v3343_v23, 94 }
  0xb1   : > { %1061 = vrot.lane.b32.xlu0 %v3243_v29, %s2975_s28  ;;  %1059 = vrot.lane.b32.xlu2 %v3240_v7, %s2975_s28  ;;  %v881_v31 = vpop.f32.mrf.mxu1  ;;  %v2629_v36 = vpack.i.bf16 %v3243_v29, %v3240_v7  ;;  %v862_v59 = vadd.f32 %v861_v32, %v3224_v13  ;;  %vm1141_vm2 = vcmp.lt.s32.totalorder %v3343_v23, 127  ;;  %vm1110_vm3 = vcmp.lt.s32.totalorder %v3343_v23, 1 }
  0xb2   : > { %1063 = vrot.lane.b32.xlu1 %v3246_v18, %s2975_s28  ;;  %v2639_v35 = vpack.i.bf16 %v3246_v18, %v3243_v29  ;;  %v882_v42 = vadd.f32 %v881_v31, %v3224_v13 }
  0xb3   : > { %v978_v2 = vmul.f32 0.2, %v862_v59  ;;  %vm968_vm14 = vcmp.ge.f32.partialorder %v862_v59, 0.0 }
  0xb4   : > { %vm969_vm11 = vcmp.ge.f32.partialorder %v882_v42, 0.0  ;;  %v979_v53 = vmul.f32 0.2, %v882_v42 }
  0xb5   : > { %v988_v9 = vsel %vm968_vm14, %v862_v59, %v978_v2 }
  0xb6   : > { %v989_v61 = vsel %vm969_vm11, %v882_v42, %v979_v53  ;;  %v3322_v11 = vmul.f32 %v3312_v8, %v988_v9 }
  0xb7   : > { %v901_v38 = vpop.f32.mrf.mxu2  ;;  %v3303_v0 = vmul.f32 %v3294_v58, %v989_v61 }
  0xb8   : > { %v921_v39 = vpop.f32.mrf.mxu3  ;;  %v902_v40 = vadd.f32 %v901_v38, %v3224_v13 }
  0xb9   : > { %v922_v41 = vadd.f32 %v921_v39, %v3224_v13  ;;  %2640 = vrot.lane.b32.xlu0 %v2639_v35, %s2976_s29  ;;  %2630 = vrot.lane.b32.xlu2 %v2629_v36, %s2977_s30 }
  0xba   : > { %1065 = vrot.lane.b32.xlu1 %v3262_v37, %s2975_s28  ;;  %vm970_vm9 = vcmp.ge.f32.partialorder %v902_v40, 0.0  ;;  %v980_v44 = vmul.f32 0.2, %v902_v40 }
  0xbb   : > { %vm971_vm10 = vcmp.ge.f32.partialorder %v922_v41, 0.0  ;;  %v981_v45 = vmul.f32 0.2, %v922_v41 }
  0xbc   : > { %v990_v47 = vsel %vm970_vm9, %v902_v40, %v980_v44  ;;  %v941_v50 = vpop.f32.mrf.mxu0 }
  0xbd   : > { %v991_v48 = vsel %vm971_vm10, %v922_v41, %v981_v45  ;;  %v961_v49 = vpop.f32.mrf.mxu1  ;;  %v3284_v54 = vmul.f32 %v3270_v30, %v990_v47  ;;  %v942_v57 = vadd.f32 %v941_v50, %v3224_v13 }
  0xbe   : > { %v962_v51 = vadd.f32 %v961_v49, %v3224_v13  ;;  %v3287_v55 = vmul.f32 %v3278_v46, %v991_v48 }
  0xbf   : > { %4657 = vst [vmem:[#allocation9_spill] sm:$0xff] %v3284_v54  ;;  %v982_v63 = vmul.f32 0.2, %v942_v57  ;;  %vm972_vm13 = vcmp.ge.f32.partialorder %v942_v57, 0.0  ;;  %v2644_v1 = vpack.i.bf16 %v3284_v54, %v3303_v0 }
  0xc0   : > { %4658 = vst [vmem:[#allocation10_spill] sm:$0xff] %v3287_v55  ;;  %vm973_vm12 = vcmp.ge.f32.partialorder %v962_v51, 0.0  ;;  %v983_v56 = vmul.f32 0.2, %v962_v51  ;;  %v2649_v12 = vpack.i.bf16 %v3287_v55, %v3262_v37 }
  0xc1   : > { %1071 = vrot.lane.b32.xlu0 %v3284_v54, %s2975_s28  ;;  %2635 = vrot.lane.b32.xlu2 %v2629_v36, %s2978_s15  ;;  %v992_v5 = vsel %vm972_vm13, %v942_v57, %v982_v63 }
  0xc2   : > { %v993_v60 = vsel %vm973_vm12, %v962_v51, %v983_v56  ;;  %1073 = vrot.lane.b32.xlu1 %v3287_v55, %s2975_s28  ;;  %v3319_v10 = vmul.f32 %v3305_v3, %v992_v5 }
  0xc3   : > { %v3300_v62 = vmul.f32 %v3281_v52, %v993_v60 }
  0xc4   : > { %v2664_v13 = vpack.i.bf16 %v3322_v11, %v3319_v10  ;;  %v2674_v17 = vpack.i.bf16 %v3319_v10, %v3246_v18 }
  0xc5   : > { %v2659_v4 = vpack.i.bf16 %v3300_v62, %v3246_v18  ;;  %v2669_v16 = vpack.i.bf16 %v3300_v62, %v3262_v37 }
  0xc9   : > { %2660 = vrot.lane.b32.xlu0 %v2659_v4, %s2977_s30  ;;  %1069 = vrot.lane.b32.xlu2 %v3303_v0, %s2975_s28 }
  0xca   : > { %2645 = vrot.lane.b32.xlu1 %v2644_v1, %s2977_s30 }
  0xd1   : > { %2665 = vrot.lane.b32.xlu0 %v2664_v13, %s2977_s30  ;;  %1067 = vrot.lane.b32.xlu2 %v3322_v11, %s2975_s28 }
  0xd2   : > { %2655 = vrot.lane.b32.xlu1 %v2644_v1, %s2976_s29 }
  0xd9   : > { %1075 = vrot.lane.b32.xlu0 %v3319_v10, %s2975_s28  ;;  %2650 = vrot.lane.b32.xlu2 %v2649_v12, %s2977_s30 }
  0xda   : > { %1077 = vrot.lane.b32.xlu1 %v3300_v62, %s2975_s28 }
  0xe1   : > { %2670 = vrot.lane.b32.xlu0 %v2669_v16, %s2976_s29  ;;  %2675 = vrot.lane.b32.xlu2 %v2674_v17, %s2978_s15 }
 0x10b   : > { %v1060_v6 = vpop.permute.xlu2 %1059 }
 0x113   : > { %v2631_v24 = vpop.permute.xlu2 %2630 }
 0x114   : > { %v2633_v25 = vunpack.i.h.bf16 %v2631_v24  ;;  %v2632_v26 = vunpack.i.l.bf16 %v2631_v24 }
 0x116   : > { %v3348_v27 = vsel %vm1048_vm15, %v2632_v26, %v2633_v25 }
 0x117   : > { %v2679_v28 = vpack.i.bf16 %v3300_v62, %v3348_v27 }
 0x119   : > { %2680 = vrot.lane.b32.xlu1 %v2679_v28, %s2978_s15 }
 0x11b   : > { %v3353_v15 = vpop.permute.xlu2 %2635 }
 0x123   : > { %v1062_v21 = vpop.permute.xlu0 %1061  ;;  %v1070_v35 = vpop.permute.xlu2 %1069 }
 0x124   : > { %v3358_v31 = vsel %vm1079_vm1, %v1060_v6, %v1062_v21  ;;  %v1064_v32 = vpop.permute.xlu1 %1063 }
 0x125   : > { %1242 = vrot.lane.b32.xlu0 %v3358_v31, %s2976_s29  ;;  %v3364_v34 = vsel %vm1079_vm1, %v1062_v21, %v1064_v32 }
 0x126   : > { %1244 = vrot.lane.b32.xlu1 %v3364_v34, %s2976_s29  ;;  %v2684_v39 = vpack.i.bf16 %v3364_v34, %v3358_v31 }
 0x12b   : > { %v3368_v36 = vpop.permute.xlu0 %2640  ;;  %v1068_v42 = vpop.permute.xlu2 %1067 }
 0x12c   : > { %v1066_v38 = vpop.permute.xlu1 %1065  ;;  %v3384_v45 = vsel %vm1079_vm1, %v1068_v42, %v1070_v35 }
 0x12d   : > { %v3374_v40 = vsel %vm1079_vm1, %v1064_v32, %v1066_v38  ;;  %v3405_v4 = vsel %vm1079_vm1, %v1066_v38, %v1068_v42 }
 0x12e   : > { %1246 = vrot.lane.b32.xlu2 %v3374_v40, %s2976_s29  ;;  %2685 = vrot.lane.b32.xlu1 %v2684_v39, %s2978_s15  ;;  %v2694_v41 = vpack.i.bf16 %v3374_v40, %v3262_v37  ;;  %v2699_v16 = vpack.i.bf16 %v3405_v4, %v3303_v0 }
 0x130   : > { %2695 = vrot.lane.b32.xlu0 %v2694_v41, %s2978_s15 }
 0x133   : > { %v1072_v43 = vpop.permute.xlu0 %1071  ;;  %v2651_v56 = vpop.permute.xlu2 %2650 }
 0x134   : > { %v1074_v44 = vpop.permute.xlu1 %1073  ;;  %v2652_v61 = vunpack.i.l.bf16 %v2651_v56  ;;  %v3440_v32 = vsel %vm1079_vm1, %v1070_v35, %v1072_v43 }
 0x135   : > { %v3390_v47 = vsel %vm1079_vm1, %v1072_v43, %v1074_v44 }
 0x136   : > { %1250 = vrot.lane.b32.xlu2 %v3384_v45, %s2976_s29 }
 0x138   : > { %1254 = vrot.lane.b32.xlu0 %v3390_v47, %s2976_s29 }
 0x13b   : > { %v2661_v48 = vpop.permute.xlu0 %2660 }
 0x13c   : > { %v2662_v49 = vunpack.i.l.bf16 %v2661_v48  ;;  %v2646_v50 = vpop.permute.xlu1 %2645  ;;  %v2663_v17 = vunpack.i.h.bf16 %v2661_v48 }
 0x13d   : > { %v2648_v57 = vunpack.i.h.bf16 %v2646_v50  ;;  %v2647_v59 = vunpack.i.l.bf16 %v2646_v50 }
 0x13e   : > { %v3396_v51 = vsel %vm1048_vm15, %v2633_v25, %v2662_v49  ;;  %v3434_v25 = vsel %vm1048_vm15, %v2663_v17, %v2632_v26  ;;  %v2714_v26 = vpack.i.bf16 %v3440_v32, %v3384_v45  ;;  %v3468_v43 = vsel %vm1048_vm15, %v2662_v49, %v2652_v61 }
 0x13f   : > { %v2689_v53 = vpack.i.bf16 %v3396_v51, %v3348_v27  ;;  %v3409_v5 = vsel %vm1048_vm15, %v2647_v59, %v2648_v57  ;;  %v2724_v42 = vpack.i.bf16 %v3434_v25, %v3240_v7 }
 0x140   : > { %4662 = vst [vmem:[#allocation14_spill] sm:$0xff] %v3409_v5 }
 0x141   : > { %2690 = vrot.lane.b32.xlu1 %v2689_v53, %s2976_s29 }
 0x143   : > { %v2666_v60 = vpop.permute.xlu0 %2665 }
 0x144   : > { %v2668_v63 = vunpack.i.h.bf16 %v2666_v60  ;;  %v3401_v2 = vpop.permute.xlu1 %2655  ;;  %v2667_v21 = vunpack.i.l.bf16 %v2666_v60 }
 0x145   : > { %v4635_v46 = vunpack.i.h.bf16 %v3401_v2  ;;  %v4636_v58 = vunpack.i.l.bf16 %v3401_v2 }
 0x146   : > { %v3413_v1 = vsel %vm1048_vm15, %v2668_v63, %v2647_v59  ;;  %v3417_v9 = vsel %vm1048_vm15, %v2652_v61, %v2668_v63  ;;  %v2653_v59 = vunpack.i.h.bf16 %v2651_v56 }
 0x147   : > { %v2719_v13 = vpack.i.bf16 %v3409_v5, %v3413_v1  ;;  %v2709_v12 = vpack.i.bf16 %v3413_v1, %v3417_v9  ;;  %v2704_v38 = vpack.i.bf16 %v3417_v9, %v3322_v11 }
 0x148   : > { %v3490_v60 = vsel %vm1048_vm15, %v2653_v59, %v2667_v21 }
 0x149   : > { %2720 = vrot.lane.b32.xlu0 %v2719_v13, %s2976_s29  ;;  %2710 = vrot.lane.b32.xlu2 %v2709_v12, %s2978_s15  ;;  %4663 = vst [vmem:[#allocation15_spill] sm:$0xff] %v3490_v60  ;;  %v2749_v61 = vpack.i.bf16 %v3490_v60, %v3319_v10  ;;  %v2764_v13 = vpack.i.bf16 %v3287_v55, %v3490_v60 }
 0x14a   : > { %2700 = vrot.lane.b32.xlu1 %v2699_v16, %s2978_s15 }
 0x14b   : > { %v1076_v39 = vpop.permute.xlu0 %1075 }
 0x14c   : > { %v1078_v19 = vpop.permute.xlu1 %1077  ;;  %v3478_v50 = vsel %vm1079_vm1, %v1074_v44, %v1076_v39  ;;  %v3494_v44 = vsel %vm1048_vm15, %v2648_v57, %v2653_v59  ;;  %v3514_v57 = vpop.permute.xlu2 %2675  ;;  %v1373_v59 = vrot.slane %v3364_v34, 4  ;;  %v4614_v34 = vunpack.i.h.bf16 %v3353_v15 }
 0x14d   : > { %v3430_v24 = vsel %vm1079_vm1, %v1078_v19, %v1060_v6  ;;  %v3450_v6 = vsel %vm1048_vm15, %v2667_v21, %v2663_v17  ;;  %v3462_v41 = vsel %vm1079_vm1, %v1076_v39, %v1078_v19  ;;  %v2754_v53 = vpack.i.bf16 %v3396_v51, %v3478_v50  ;;  %4664 = vst [vmem:[#allocation16_spill] sm:$0xff] %v3494_v44 }
 0x14e   : > { %v2729_v28 = vpack.i.bf16 %v3434_v25, %v3430_v24  ;;  %v2734_v35 = vpack.i.bf16 %v3322_v11, %v3450_v6  ;;  %v2739_v48 = vpack.i.bf16 %v3468_v43, %v3462_v41  ;;  %v2744_v49 = vpack.i.bf16 %v3450_v6, %v3468_v43 }
 0x14f   : > { %v2759_v63 = vpack.i.bf16 %v3390_v47, %v3494_v44  ;;  %v2769_v56 = vpack.i.bf16 %v3494_v44, %v3287_v55 }
 0x151   : > { %1252 = vrot.lane.b32.xlu2 %v3440_v32, %s2976_s29  ;;  %2730 = vrot.lane.b32.xlu0 %v2729_v28, %s2978_s15 }
 0x152   : > { %2705 = vrot.lane.b32.xlu1 %v2704_v38, %s2976_s29 }
 0x153   : > { %v3516_v12 = vpop.permute.xlu0 %2670 }
 0x154   : > { %v2672_v8 = vunpack.i.l.bf16 %v3516_v12 }
 0x159   : > { %2715 = vrot.lane.b32.xlu2 %v2714_v26, %s2978_s15  ;;  %2735 = vrot.lane.b32.xlu0 %v2734_v35, %s2978_s15  ;;  %v2643_v26 = vunpack.i.h.bf16 %v3368_v36  ;;  %v2642_v35 = vunpack.i.l.bf16 %v3368_v36 }
 0x15a   : > { %1248 = vrot.lane.b32.xlu1 %v3405_v4, %s2976_s29 }
 0x161   : > { %2725 = vrot.lane.b32.xlu2 %v2724_v42, %s2976_s29  ;;  %1258 = vrot.lane.b32.xlu0 %v3462_v41, %s2976_s29  ;;  %v1209_v42 = vsel %vm1141_vm2, %v2642_v35, %v2643_v26 }
 0x162   : > { %2740 = vrot.lane.b32.xlu1 %v2739_v48, %s2978_s15 }
 0x169   : > { %1260 = vrot.lane.b32.xlu2 %v3430_v24, %s2976_s29  ;;  %2755 = vrot.lane.b32.xlu0 %v2754_v53, %s2978_s15 }
 0x16a   : > { %2745 = vrot.lane.b32.xlu1 %v2744_v49, %s2976_s29 }
 0x171   : > { %2750 = vrot.lane.b32.xlu2 %v2749_v61, %s2976_s29  ;;  %2760 = vrot.lane.b32.xlu0 %v2759_v63, %s2978_s15  ;;  %v1343_v61 = vrot.slane %v1209_v42, 4 }
 0x172   : > { %2765 = vrot.lane.b32.xlu1 %v2764_v13, %s2978_s15 }
 0x179   : > { %1256 = vrot.lane.b32.xlu2 %v3478_v50, %s2976_s29  ;;  %1102 = vrot.lane.b32.xlu0 %v3409_v5, %s2978_s15 }
 0x17a   : > { %2770 = vrot.lane.b32.xlu1 %v2769_v56, %s2976_s29  ;;  %v1413_v56 = vsel %vm743_vm0, %v3243_v29, %v1343_v61 }
 0x181   : > { %1164 = vrot.lane.b32.xlu2 %v3284_v54, %s2978_s15 }
 0x188   : > { %v3520_v17 = vpop.permute.xlu2 %1246 }
 0x18b   : > { %v3518_v16 = vpop.permute.xlu1 %2680 }
 0x18c   : > { %v4666_v55 = vunpack.i.l.bf16 %v3518_v16 }
 0x190   : > { %v3535_v39 = vpop.permute.xlu2 %1250 }
 0x197   : > { %v3523_v19 = vpop.permute.xlu0 %1242 }
 0x198   : > { %v1245_v28 = vpop.permute.xlu1 %1244 }
 0x199   : > { %v1269_v21 = vsel %vm1141_vm2, %v1245_v28, %v3520_v17  ;;  %v1270_v38 = vsel %vm1141_vm2, %v3523_v19, %v1245_v28 }
 0x19a   : > { %2571 = vmatpush.msk.msra.mxu2 %vm743_vm0, %v1270_v38  ;;  %2573 = vmatpush.msk.msra.mxu3 %vm743_vm0, %v1269_v21  ;;  %v2637_v38 = vunpack.i.l.bf16 %v3353_v15 }
 0x19c   : > { %v1180_v42 = vsel %vm1110_vm3, %v2637_v38, %v4614_v34 }
 0x1a0   : > { %v3539_v48 = vpop.permute.xlu1 %2685 }
 0x1a1   : > { %v4611_v53 = vunpack.i.h.bf16 %v3539_v48  ;;  %v2687_v49 = vunpack.i.l.bf16 %v3539_v48 }
 0x1a2   : > { %v3554_v28 = vpop.permute.xlu0 %2695 }
 0x1a3   : > { %v3545_v63 = vpop.permute.xlu2 %2710  ;;  %v1240_v36 = vsel %vm1110_vm3, %v2687_v49, %v4611_v53  ;;  %v2698_v44 = vunpack.i.h.bf16 %v3554_v28 }
 0x1a4   : > { %v1423_v13 = vsel %vm743_vm0, %v1240_v36, %v1373_v59 }
 0x1a5   : > { %1505 = vmatpush.msra.mxu3 %v1423_v13  ;;  %v1313_v13 = vrot.slane %v1180_v42, 4 }
 0x1a7   : > { %1506 = vmatpush.msra.mxu3 %v1413_v56 }
 0x1aa   : > { %v3564_v53 = vpop.permute.xlu0 %1254 }
 0x1ab   : > { %v3556_v21 = vpop.permute.xlu2 %1252 }
 0x1b3   : > { %v3566_v59 = vpop.permute.xlu2 %2715  ;;  %v3568_v36 = vpop.permute.xlu1 %2690 }
 0x1b4   : > { %v4627_v29 = vunpack.i.h.bf16 %v3568_v36  ;;  %v2692_v61 = vunpack.i.l.bf16 %v3568_v36 }
 0x1b6   : > { %v1149_v56 = vsel %vm1141_vm2, %v2692_v61, %v4627_v29  ;;  %v1372_v29 = vrot.slane %v3358_v31, 4  ;;  %v3613_v31 = vsel %vm1141_vm2, %v2643_v26, %v2672_v8 }
 0x1b7   : > { %v1403_v52 = vsel %vm743_vm0, %v1149_v56, %v1313_v13  ;;  %v1283_v56 = vrot.slane %v3348_v27, 4 }
 0x1b8   : > { %1507 = vmatpush.msra.mxu3 %v1403_v52  ;;  %v1205_v52 = vsel %vm1141_vm2, %v4636_v58, %v4635_v46 }
 0x1b9   : > { %v1347_v33 = vrot.slane %v1205_v52, 4  ;;  %v4668_v52 = vunpack.i.l.bf16 %v3566_v59 }
 0x1bb   : > { %v3577_v34 = vpop.permute.xlu0 %2720  ;;  %v3579_v3 = vpop.permute.xlu2 %2725  ;;  %v1417_v60 = vsel %vm743_vm0, %v3303_v0, %v1347_v33  ;;  %v4670_v33 = vunpack.i.h.bf16 %v3539_v48 }
 0x1bc   : > { %v3581_v30 = vpop.permute.xlu1 %2700  ;;  %v4637_v42 = vunpack.i.l.bf16 %v3579_v3 }
 0x1bd   : > { %v1239_v0 = vsel %vm1110_vm3, %v4670_v33, %v2698_v44  ;;  %v1282_v33 = vrot.slane %v3434_v25, 4 }
 0x1be   : > { %v1210_v13 = vsel %vm1141_vm2, %v4637_v42, %v2642_v35  ;;  %v4665_v42 = vunpack.i.h.bf16 %v3518_v16 }
 0x1bf   : > { %v1342_v20 = vrot.slane %v1210_v13, 4 }
 0x1c0   : > { %v1181_v22 = vsel %vm1110_vm3, %v4665_v42, %v2637_v38  ;;  %v4667_v42 = vunpack.i.h.bf16 %v3566_v59 }
 0x1c2   : > { %v1236_v13 = vsel %vm1110_vm3, %v4668_v52, %v4667_v42  ;;  %v1374_v52 = vrot.slane %v3374_v40, 4  ;;  %v1344_v40 = vrot.slane %v3613_v31, 4 }
 0x1c3   : > { %v3603_v14 = vpop.permute.xlu0 %2730  ;;  %v3683_v48 = vpop.permute.xlu2 %1260 }
 0x1c4   : > { %v3607_v58 = vpop.permute.xlu1 %2705  ;;  %v2733_v35 = vunpack.i.h.bf16 %v3603_v14  ;;  %v4641_v27 = vunpack.i.l.bf16 %v3603_v14 }
 0x1c5   : > { %v2707_v46 = vunpack.i.l.bf16 %v3607_v58 }
 0x1c6   : > { %v1241_v5 = vsel %vm1110_vm3, %v4641_v27, %v2687_v49  ;;  %v1119_v26 = vsel %vm1110_vm3, %v2733_v35, %v4666_v55  ;;  %v3640_v49 = vld [vmem:[%s4603_s5] sm:$0xff]  ;;  %v1312_v27 = vrot.slane %v1181_v22, 4  ;;  %v2722_v22 = vunpack.i.l.bf16 %v3577_v34 }
 0x1c7   : > { %v1422_v54 = vsel %vm743_vm0, %v1241_v5, %v1372_v29  ;;  %v1393_v38 = vsel %vm743_vm0, %v1119_v26, %v1283_v56  ;;  %v1433_v55 = vld [vmem:[%s4604_s6] sm:$0xff]  ;;  %v1377_v5 = vrot.slane %v3440_v32, 4  ;;  %v1265_v29 = vsel %vm1141_vm2, %v3556_v21, %v3564_v53 }
 0x1c8   : > { %v2703_v56 = vunpack.i.h.bf16 %v3581_v30  ;;  %1485 = vmatpush.msra.mxu2 %v1422_v54  ;;  %1508 = vmatpush.msra.mxu3 %v1393_v38  ;;  %v4669_v26 = vunpack.i.h.bf16 %v3579_v3  ;;  %v1412_v32 = vsel %vm743_vm0, %v3240_v7, %v1342_v20  ;;  %v2713_v54 = vunpack.i.h.bf16 %v3545_v63 }
 0x1c9   : > { %1436 = vperm.xlu1 %2774, %v1433_v55   ;;  %v1207_v38 = vsel %vm1141_vm2, %v2672_v8, %v2707_v46  ;;  %2574 = vmatmul.msk.f32.vlgmr.msra.gmra.mxu3 %vm1439_vm4, %v3640_v49  ;;  %v2723_v20 = vunpack.i.h.bf16 %v3577_v34 }
 0x1ca   : > { %v1150_v42 = vsel %vm1141_vm2, %v4669_v26, %v2692_v61  ;;  %2581 = vmatpush.msk.msrb.mxu3 %vm743_vm0, %v1265_v29  ;;  %1486 = vmatpush.msra.mxu2 %v1412_v32  ;;  %v1427_v61 = vsel %vm743_vm0, %v1236_v13, %v1377_v5  ;;  %v2702_v13 = vunpack.i.l.bf16 %v3581_v30  ;;  %v1238_v29 = vsel %vm1110_vm3, %v2698_v44, %v2703_v56 }
 0x1cb   : > { %v3670_v7 = vpop.permute.xlu0 %2735  ;;  %v1402_v8 = vsel %vm743_vm0, %v1150_v42, %v1312_v27  ;;  %v1345_v42 = vrot.slane %v1207_v38, 4  ;;  %v4671_v26 = vrot.slane %v3405_v4, 4  ;;  %v1145_v4 = vsel %vm1141_vm2, %v2722_v22, %v2723_v20 }
 0x1cc   : > { %1585 = vmatpush.msrb.mxu3 %v1427_v61  ;;  %v1249_v55 = vpop.permute.xlu1 %1248  ;;  %v2738_v5 = vunpack.i.h.bf16 %v3670_v7  ;;  %v2737_v31 = vunpack.i.l.bf16 %v3670_v7  ;;  %1487 = vmatpush.msra.mxu2 %v1402_v8  ;;  %v2673_v61 = vunpack.i.h.bf16 %v3516_v12  ;;  %v1424_v8 = vsel %vm743_vm0, %v1239_v0, %v1374_v52 }
 0x1cd   : > { %v1267_v32 = vsel %vm1141_vm2, %v1249_v55, %v3535_v39  ;;  %v1268_v27 = vsel %vm1141_vm2, %v3520_v17, %v1249_v55  ;;  %v1425_v17 = vsel %vm743_vm0, %v1238_v29, %v4671_v26  ;;  %v2697_v55 = vunpack.i.l.bf16 %v3554_v28 }
 0x1ce   : > { %1586 = vmatpush.msrb.mxu3 %v1417_v60  ;;  %2575 = vmatpush.msk.msrb.mxu0 %vm743_vm0, %v1268_v27  ;;  %v1176_v44 = vsel %vm1110_vm3, %v2738_v5, %v2702_v13  ;;  %v1120_v60 = vsel %vm1110_vm3, %v2737_v31, %v2733_v35  ;;  %v1414_v35 = vsel %vm743_vm0, %v3246_v18, %v1344_v40  ;;  %v4673_v52 = vunpack.i.l.bf16 %v3545_v63 }
 0x1cf   : > { %2577 = vmatpush.msk.msrb.mxu1 %vm743_vm0, %v1267_v32  ;;  %v1317_v38 = vrot.slane %v1176_v44, 4  ;;  %v4672_v32 = vunpack.i.l.bf16 %v3401_v2  ;;  %v1392_v25 = vsel %vm743_vm0, %v1120_v60, %v1282_v33  ;;  %v1415_v28 = vsel %vm743_vm0, %v3262_v37, %v1345_v42 }
 0x1d0   : > { %1525 = vmatpush.msrb.mxu0 %v1424_v8  ;;  %1488 = vmatpush.msra.mxu2 %v1392_v25  ;;  %v1115_v0 = vsel %vm1110_vm3, %v4673_v52, %v2713_v54  ;;  %v1177_v29 = vsel %vm1110_vm3, %v2697_v55, %v2738_v5  ;;  %v4674_v18 = vunpack.i.l.bf16 %v3566_v59  ;;  %v1287_v40 = vrot.slane %v3413_v1, 4 }
 0x1d1   : > { %v1206_v27 = vsel %vm1141_vm2, %v2707_v46, %v4672_v32  ;;  %1545 = vmatpush.msrb.mxu1 %v1425_v17  ;;  %v1407_v46 = vsel %vm743_vm0, %v1145_v4, %v1317_v38  ;;  %v1376_v26 = vrot.slane %v3384_v45, 4  ;;  %v1266_v42 = vsel %vm1141_vm2, %v3535_v39, %v3556_v21  ;;  %2572 = vmatmul.msk.f32.vlgmr.msra.gmra.mxu2 %vm1439_vm4, %v3640_v49  ;;  %v3765_v4 = vpop.permute.xlu2 %2750 }
 0x1d2   : > { %1526 = vmatpush.msrb.mxu0 %v1414_v35  ;;  %v1237_v37 = vsel %vm1110_vm3, %v2703_v56, %v4674_v18  ;;  %v4675_v44 = vunpack.i.l.bf16 %v3579_v3  ;;  %1587 = vmatpush.msrb.mxu3 %v1407_v46  ;;  %v1346_v1 = vrot.slane %v1206_v27, 4  ;;  %v2677_v45 = vunpack.i.l.bf16 %v3514_v57 }
 0x1d3   : > { %1546 = vmatpush.msrb.mxu1 %v1415_v28  ;;  %v3750_v56 = vpop.permute.xlu0 %1258  ;;  %v2708_v33 = vunpack.i.h.bf16 %v3607_v58  ;;  %2579 = vmatpush.msk.msrb.mxu2 %vm743_vm0, %v1266_v42  ;;  %v1397_v39 = vsel %vm743_vm0, %v1115_v0, %v1287_v40  ;;  %v1426_v60 = vsel %vm743_vm0, %v1237_v37, %v1376_v26  ;;  %v1316_v38 = vrot.slane %v1177_v29, 4 }
 0x1d4   : > { %v1211_v5 = vsel %vm1141_vm2, %v2673_v61, %v4675_v44  ;;  %v2741_v8 = vpop.permute.xlu1 %2740  ;;  %1588 = vmatpush.msrb.mxu3 %v1397_v39  ;;  %v1381_v32 = vrot.slane %v3430_v24, 4  ;;  %v1271_v27 = vsel %vm1141_vm2, %v3683_v48, %v3523_v19  ;;  %v2678_v25 = vunpack.i.h.bf16 %v3514_v57 }
 0x1d5   : > { %v2743_v21 = vunpack.i.h.bf16 %v2741_v8  ;;  %v2742_v17 = vunpack.i.l.bf16 %v2741_v8  ;;  %1565 = vmatpush.msrb.mxu2 %v1426_v60  ;;  %2582 = vmatmul.msk.f32.vlgmr.msrb.gmra.mxu3 %vm1439_vm4, %v3640_v49  ;;  %v1351_v58 = vrot.slane %v1211_v5, 4  ;;  %v1416_v35 = vsel %vm743_vm0, %v3322_v11, %v1346_v1 }
 0x1d6   : > { %2589 = vmatpush.msk.msra.mxu3 %vm743_vm0, %v1271_v27  ;;  %v4676_v24 = vunpack.i.l.bf16 %v3603_v14  ;;  %v4677_v19 = vunpack.i.h.bf16 %v3353_v15  ;;  %v1146_v52 = vsel %vm1141_vm2, %v2708_v33, %v2722_v22  ;;  %v4678_v0 = vunpack.i.l.bf16 %v3545_v63 }
 0x1d7   : > { %1566 = vmatpush.msrb.mxu2 %v1416_v35  ;;  %v4679_v29 = vunpack.i.h.bf16 %v3518_v16  ;;  %v1406_v18 = vsel %vm743_vm0, %v1146_v52, %v1316_v38  ;;  %v1286_v37 = vrot.slane %v3417_v9, 4  ;;  %v1178_v22 = vsel %vm1110_vm3, %v2677_v45, %v2697_v55 }
 0x1d8   : > { %v1232_v28 = vsel %vm1110_vm3, %v2742_v17, %v4676_v24  ;;  %v1179_v46 = vsel %vm1110_vm3, %v4677_v19, %v2677_v45  ;;  %v1116_v14 = vsel %vm1110_vm3, %v2743_v21, %v4678_v0  ;;  %v2752_v40 = vunpack.i.l.bf16 %v3765_v4 }
 0x1d9   : > { %v1431_v11 = vsel %vm743_vm0, %v1232_v28, %v1381_v32  ;;  %v1172_v15 = vsel %vm1110_vm3, %v2678_v25, %v4679_v29  ;;  %1567 = vmatpush.msrb.mxu2 %v1406_v18  ;;  %v1421_v26 = vsel %vm743_vm0, %v3300_v62, %v1351_v58  ;;  %v1396_v42 = vsel %vm743_vm0, %v1116_v14, %v1286_v37 }
 0x1da   : > { %1665 = vmatpush.msra.mxu3 %v1431_v11  ;;  %v1314_v5 = vrot.slane %v1179_v46, 4  ;;  %v1284_v1 = vrot.slane %v3396_v51, 4  ;;  %v1285_v8 = vrot.slane %v3468_v43, 4  ;;  %v1380_v9 = vrot.slane %v3462_v41, 4  ;;  %v1257_v46 = vpop.permute.xlu2 %1256 }
 0x1db   : > { %v2756_v44 = vpop.permute.xlu0 %2755  ;;  %1568 = vmatpush.msrb.mxu2 %v1396_v42  ;;  %v1321_v60 = vrot.slane %v1172_v15, 4  ;;  %v1262_v62 = vsel %vm1141_vm2, %v3750_v56, %v3683_v48  ;;  %v1315_v51 = vrot.slane %v1178_v22, 4  ;;  %v1202_v41 = vsel %vm1141_vm2, %v2752_v40, %v2673_v61 }
 0x1dc   : > { %1666 = vmatpush.msra.mxu3 %v1421_v26  ;;  %v3804_v39 = vpop.permute.xlu1 %2745  ;;  %v2758_v55 = vunpack.i.h.bf16 %v2756_v44  ;;  %v2757_v45 = vunpack.i.l.bf16 %v2756_v44  ;;  %2580 = vmatmul.msk.f32.vlgmr.msrb.gmra.mxu2 %vm1439_vm4, %v3640_v49  ;;  %v4680_v43 = vunpack.i.l.bf16 %v3518_v16  ;;  %v4681_v12 = vunpack.i.h.bf16 %v3568_v36 }
 0x1dd   : > { %v2748_v38 = vunpack.i.h.bf16 %v3804_v39  ;;  %v2747_v32 = vunpack.i.l.bf16 %v3804_v39  ;;  %2587 = vmatpush.msk.msra.mxu2 %vm743_vm0, %v1262_v62  ;;  %v4682_v24 = vunpack.i.h.bf16 %v3579_v3  ;;  %v1350_v52 = vrot.slane %v1202_v41, 4 }
 0x1de   : > { %v1118_v48 = vsel %vm1110_vm3, %v4680_v43, %v2758_v55  ;;  %v1117_v27 = vsel %vm1110_vm3, %v2758_v55, %v2743_v21  ;;  %v1233_v58 = vsel %vm1110_vm3, %v2757_v45, %v2742_v17  ;;  %v1378_v3 = vrot.slane %v3390_v47, 4 }
 0x1df   : > { %v1148_v35 = vsel %vm1141_vm2, %v4681_v12, %v2747_v32  ;;  %v1147_v61 = vsel %vm1141_vm2, %v2747_v32, %v2708_v33  ;;  %v1151_v16 = vsel %vm1141_vm2, %v2748_v38, %v4682_v24  ;;  %v1394_v28 = vsel %vm743_vm0, %v1118_v48, %v1284_v1  ;;  %v4686_v12 = vld [vmem:[#allocation9_spill] sm:$0xff] }
 0x1e0   : > { %v1404_v21 = vsel %vm743_vm0, %v1148_v35, %v1314_v5  ;;  %v1405_v19 = vsel %vm743_vm0, %v1147_v61, %v1315_v51  ;;  %v1411_v17 = vsel %vm743_vm0, %v1151_v16, %v1321_v60  ;;  %v1395_v36 = vsel %vm743_vm0, %v1117_v27, %v1285_v8  ;;  %v4684_v5 = vld [vmem:[#allocation15_spill] sm:$0xff]  ;;  %v4687_v35 = vld [vmem:[#allocation10_spill] sm:$0xff] }
 0x1e1   : > { %1527 = vmatpush.msrb.mxu0 %v1404_v21  ;;  %1547 = vmatpush.msrb.mxu1 %v1405_v19  ;;  %v1430_v33 = vsel %vm743_vm0, %v1233_v58, %v1380_v9  ;;  %v1264_v0 = vsel %vm1141_vm2, %v3564_v53, %v1257_v46  ;;  %v1263_v14 = vsel %vm1141_vm2, %v1257_v46, %v3750_v56  ;;  %v1291_v56 = vrot.slane %v3450_v6, 4  ;;  %v4689_v19 = vld [vmem:[#allocation16_spill] sm:$0xff] }
 0x1e2   : > { %1667 = vmatpush.msra.mxu3 %v1411_v17  ;;  %1645 = vmatpush.msra.mxu2 %v1430_v33  ;;  %v1420_v53 = vsel %vm743_vm0, %v3319_v10, %v1350_v52  ;;  %v1379_v22 = vrot.slane %v3478_v50, 4  ;;  %v4683_v26 = vunpack.i.h.bf16 %v3566_v59  ;;  %v1290_v1 = vrot.slane %v4684_v5, 4 }
 0x1e3   : > { %1528 = vmatpush.msrb.mxu0 %v1394_v28  ;;  %1548 = vmatpush.msrb.mxu1 %v1395_v36  ;;  %v2761_v11 = vpop.permute.xlu0 %2760  ;;  %v2753_v8 = vunpack.i.h.bf16 %v3765_v4  ;;  %v4685_v41 = vunpack.i.h.bf16 %v3401_v2  ;;  %v4688_v28 = vld [vmem:[#allocation14_spill] sm:$0xff]  ;;  %v1289_v17 = vrot.slane %v4689_v19, 4 }
 0x1e4   : > { %v2766_v29 = vpop.permute.xlu1 %2765  ;;  %2576 = vmatmul.msk.f32.vlgmr.msrb.gmra.mxu0 %vm1439_vm4, %v3640_v49  ;;  %2578 = vmatmul.msk.f32.vlgmr.msrb.gmra.mxu1 %vm1439_vm4, %v3640_v49  ;;  %v2763_v15 = vunpack.i.h.bf16 %v2761_v11  ;;  %v2762_v47 = vunpack.i.l.bf16 %v2761_v11  ;;  %v1288_v21 = vrot.slane %v4688_v28, 4 }
 0x1e5   : > { %v2768_v18 = vunpack.i.h.bf16 %v2766_v29  ;;  %v2767_v37 = vunpack.i.l.bf16 %v2766_v29  ;;  %2583 = vmatpush.msk.msra.mxu0 %vm743_vm0, %v1264_v0  ;;  %2585 = vmatpush.msk.msra.mxu1 %vm743_vm0, %v1263_v14  ;;  %v1142_v57 = vsel %vm1141_vm2, %v2753_v8, %v2748_v38  ;;  %v4690_v29 = vld [vmem:[#allocation3_spill] sm:$0xff] }
 0x1e6   : > { %1646 = vmatpush.msra.mxu2 %v1420_v53  ;;  %v1235_v42 = vsel %vm1110_vm3, %v4683_v26, %v2763_v15  ;;  %v1234_v44 = vsel %vm1110_vm3, %v2763_v15, %v2757_v45 }
 0x1e7   : > { %v1173_v10 = vsel %vm1110_vm3, %v2768_v18, %v2678_v25  ;;  %v1111_v6 = vsel %vm1110_vm3, %v2767_v37, %v2737_v31  ;;  %v1428_v50 = vsel %vm743_vm0, %v1235_v42, %v1378_v3  ;;  %v1429_v39 = vsel %vm743_vm0, %v1234_v44, %v1379_v22  ;;  %v1165_v25 = vpop.permute.xlu2 %1164 }
 0x1e8   : > { %v1401_v59 = vsel %vm743_vm0, %v1111_v6, %v1291_v56  ;;  %v1320_v9 = vrot.slane %v1173_v10, 4  ;;  %1605 = vmatpush.msra.mxu0 %v1428_v50  ;;  %v1112_v55 = vsel %vm1110_vm3, %v2762_v47, %v2767_v37  ;;  %1625 = vmatpush.msra.mxu1 %v1429_v39  ;;  %v1175_v38 = vsel %vm1110_vm3, %v2702_v13, %v1165_v25 }
 0x1e9   : > { %1668 = vmatpush.msra.mxu3 %v1401_v59  ;;  %v1400_v31 = vsel %vm743_vm0, %v1112_v55, %v1290_v1  ;;  %v1174_v32 = vsel %vm1110_vm3, %v1165_v25, %v2768_v18  ;;  %v1318_v4 = vrot.slane %v1175_v38, 4  ;;  %v4691_v18 = vld [vmem:[#allocation2_spill] sm:$0xff]  ;;  %v4693_v55 = vld [vmem:[#allocation5_spill] sm:$0xff] }
 0x1ea   : > { %2590 = vmatmul.msk.f32.vlgmr.msra.gmra.mxu3 %vm1439_vm4, %v3640_v49  ;;  %v1410_v7 = vsel %vm743_vm0, %v1142_v57, %v1320_v9  ;;  %v1319_v61 = vrot.slane %v1174_v32, 4  ;;  %v4692_v9 = vld [vmem:[#allocation4_spill] sm:$0xff]  ;;  %v4694_v38 = vld [vmem:[#allocation13_spill] sm:$0xff] }
 0x1eb   : > { %1647 = vmatpush.msra.mxu2 %v1410_v7  ;;  %v1103_v48 = vpop.permute.xlu0 %1102 }
 0x1ec   : > { %v2771_v45 = vpop.permute.xlu1 %2770  ;;  %v1113_v24 = vsel %vm1110_vm3, %v1103_v48, %v2762_v47  ;;  %v1114_v34 = vsel %vm1110_vm3, %v2713_v54, %v1103_v48 }
 0x1ed   : > { %v2773_v60 = vunpack.i.h.bf16 %v2771_v45  ;;  %v2772_v62 = vunpack.i.l.bf16 %v2771_v45  ;;  %1648 = vmatpush.msra.mxu2 %v1400_v31  ;;  %v1398_v36 = vsel %vm743_vm0, %v1114_v34, %v1288_v21  ;;  %v1399_v46 = vsel %vm743_vm0, %v1113_v24, %v1289_v17  ;;  %v4696_v21 = vld [vmem:[#allocation7_spill] sm:$0xff] }
 0x1ee   : > { %2588 = vmatmul.msk.f32.vlgmr.msra.gmra.mxu2 %vm1439_vm4, %v3640_v49 }
 0x1ef   : > { %v1203_v51 = vsel %vm1141_vm2, %v2772_v62, %v2752_v40  ;;  %v1204_v43 = vsel %vm1141_vm2, %v4685_v41, %v2772_v62  ;;  %v1144_v30 = vsel %vm1141_vm2, %v2723_v20, %v2773_v60  ;;  %v1143_v13 = vsel %vm1141_vm2, %v2773_v60, %v2753_v8 }
 0x1f0   : > { %v1348_v27 = vrot.slane %v1204_v43, 4  ;;  %v1349_v58 = vrot.slane %v1203_v51, 4  ;;  %v1408_v20 = vsel %vm743_vm0, %v1144_v30, %v1318_v4  ;;  %v1409_v16 = vsel %vm743_vm0, %v1143_v13, %v1319_v61  ;;  %v4695_v51 = vld [vmem:[#allocation11_spill] sm:$0xff] }
 0x1f2   : > { %v1418_v40 = vsel %vm743_vm0, %v4686_v12, %v1348_v27  ;;  %v1419_v2 = vsel %vm743_vm0, %v4687_v35, %v1349_v58 }
 0x1f3   : > { %1606 = vmatpush.msra.mxu0 %v1418_v40  ;;  %1626 = vmatpush.msra.mxu1 %v1419_v2 }
 0x1f5   : > { %1607 = vmatpush.msra.mxu0 %v1408_v20  ;;  %1627 = vmatpush.msra.mxu1 %v1409_v16 }
 0x1f7   : > { %1608 = vmatpush.msra.mxu0 %v1398_v36  ;;  %1628 = vmatpush.msra.mxu1 %v1399_v46 }
 0x1f8   : > { %2584 = vmatmul.msk.f32.vlgmr.msra.gmra.mxu0 %vm1439_vm4, %v3640_v49  ;;  %2586 = vmatmul.msk.f32.vlgmr.msra.gmra.mxu1 %vm1439_vm4, %v3640_v49 }
 0x23b   : > { %v1437_v63 = vpop.permute.xlu1 %1436 }
 0x24c   : > { %v1510_v54 = vpop.f32.mrf.mxu3 }
 0x24d   : > { %v1511_v33 = vadd.f32 %v1510_v54, %v1437_v63 }
 0x24f   : > { %v1684_v52 = vmul.f32 0.2, %v1511_v33  ;;  %vm1674_vm5 = vcmp.ge.f32.partialorder %v1511_v33, 0.0 }
 0x251   : > { %v1694_v0 = vsel %vm1674_vm5, %v1511_v33, %v1684_v52  ;;  %v4698_v33 = vld [vmem:[#allocation12_spill] sm:$0xff] }
 0x252   : > { %v3932_v15 = vmul.f32 %v1694_v0, %v4690_v29 }
 0x254   : > { %v1490_v3 = vpop.f32.mrf.mxu2 }
 0x255   : > { %v1491_v11 = vadd.f32 %v1490_v3, %v1437_v63  ;;  %v4699_v3 = vld [vmem:[#allocation8_spill] sm:$0xff] }
 0x257   : > { %vm1673_vm6 = vcmp.ge.f32.partialorder %v1491_v11, 0.0  ;;  %v1683_v14 = vmul.f32 0.2, %v1491_v11 }
 0x258   : > { %v1590_v26 = vpop.f32.mrf.mxu3 }
 0x259   : > { %v1693_v47 = vsel %vm1673_vm6, %v1491_v11, %v1683_v14  ;;  %v1591_v10 = vadd.f32 %v1590_v26, %v1437_v63 }
 0x25a   : > { %v3935_v37 = vmul.f32 %v1693_v47, %v4691_v18 }
 0x25b   : > { %v1688_v7 = vmul.f32 0.2, %v1591_v10  ;;  %vm1678_vm10 = vcmp.ge.f32.partialorder %v1591_v10, 0.0 }
 0x25c   : > { %v2795_v49 = vpack.i.bf16 %v3932_v15, %v3935_v37 }
 0x25d   : > { %v1698_v62 = vsel %vm1678_vm10, %v1591_v10, %v1688_v7 }
 0x25e   : > { %2796 = vrot.lane.b32.xlu1 %v2795_v49, %s2977_s30  ;;  %v3959_v41 = vmul.f32 %v1698_v62, %v4695_v51 }
 0x25f   : > { %v1570_v53 = vpop.f32.mrf.mxu2 }
 0x260   : > { %v1571_v5 = vadd.f32 %v1570_v53, %v1437_v63 }
 0x261   : > { %v1530_v56 = vpop.f32.mrf.mxu0  ;;  %v1550_v22 = vpop.f32.mrf.mxu1 }
 0x262   : > { %v1531_v42 = vadd.f32 %v1530_v56, %v1437_v63  ;;  %v1551_v44 = vadd.f32 %v1550_v22, %v1437_v63  ;;  %v1687_v59 = vmul.f32 0.2, %v1571_v5  ;;  %vm1677_vm9 = vcmp.ge.f32.partialorder %v1571_v5, 0.0 }
 0x264   : > { %vm1675_vm7 = vcmp.ge.f32.partialorder %v1531_v42, 0.0  ;;  %v1685_v1 = vmul.f32 0.2, %v1531_v42  ;;  %vm1676_vm8 = vcmp.ge.f32.partialorder %v1551_v44, 0.0  ;;  %v1686_v8 = vmul.f32 0.2, %v1551_v44 }
 0x265   : > { %v1697_v60 = vsel %vm1677_vm9, %v1571_v5, %v1687_v59 }
 0x266   : > { %v1695_v6 = vsel %vm1675_vm7, %v1531_v42, %v1685_v1  ;;  %v1696_v50 = vsel %vm1676_vm8, %v1551_v44, %v1686_v8  ;;  %v3956_v32 = vmul.f32 %v1697_v60, %v4694_v38 }
 0x267   : > { %v3941_v39 = vmul.f32 %v1695_v6, %v4692_v9  ;;  %v3944_v57 = vmul.f32 %v1696_v50, %v4693_v55 }
 0x268   : > { %v2815_v27 = vpack.i.bf16 %v3959_v41, %v3956_v32 }
 0x269   : > { %v2790_v31 = vpack.i.bf16 %v3935_v37, %v3944_v57  ;;  %v2775_v25 = vpack.i.bf16 %v3944_v57, %v3941_v39  ;;  %v2800_v45 = vpack.i.bf16 %v3935_v37, %v3941_v39  ;;  %v2780_v43 = vpack.i.bf16 %v3941_v39, %v3932_v15 }
 0x26a   : > { %v2820_v16 = vpack.i.bf16 %v3956_v32, %v3944_v57 }
 0x26b   : > { %2791 = vrot.lane.b32.xlu0 %v2790_v31, %s2975_s28  ;;  %2776 = vrot.lane.b32.xlu2 %v2775_v25, %s2977_s30 }
 0x26c   : > { %2801 = vrot.lane.b32.xlu1 %v2800_v45, %s2976_s29 }
 0x26d   : > { %v1670_v58 = vpop.f32.mrf.mxu3 }
 0x26e   : > { %v1671_v12 = vadd.f32 %v1670_v58, %v1437_v63 }
 0x270   : > { %v1692_v34 = vmul.f32 0.2, %v1671_v12  ;;  %vm1682_vm14 = vcmp.ge.f32.partialorder %v1671_v12, 0.0 }
 0x271   : > { %v1650_v48 = vpop.f32.mrf.mxu2 }
 0x272   : > { %v1651_v30 = vadd.f32 %v1650_v48, %v1437_v63  ;;  %v1702_v46 = vsel %vm1682_vm14, %v1671_v12, %v1692_v34 }
 0x273   : > { %2781 = vrot.lane.b32.xlu2 %v2780_v43, %s2975_s28  ;;  %v3984_v11 = vmul.f32 %v1702_v46, %v4699_v3 }
 0x274   : > { %2816 = vrot.lane.b32.xlu1 %v2815_v27, %s2975_s28  ;;  %v1691_v24 = vmul.f32 0.2, %v1651_v30  ;;  %vm1681_vm13 = vcmp.ge.f32.partialorder %v1651_v30, 0.0 }
 0x275   : > { %v1610_v13 = vpop.f32.mrf.mxu0  ;;  %v1630_v4 = vpop.f32.mrf.mxu1  ;;  %v2830_v14 = vpack.i.bf16 %v3984_v11, %v3956_v32  ;;  %v2835_v49 = vpack.i.bf16 %v3984_v11, %v3944_v57 }
 0x276   : > { %v1611_v40 = vadd.f32 %v1610_v13, %v1437_v63  ;;  %v1631_v35 = vadd.f32 %v1630_v4, %v1437_v63  ;;  %v1701_v17 = vsel %vm1681_vm13, %v1651_v30, %v1691_v24  ;;  %v4697_v63 = vld [vmem:[#allocation6_spill] sm:$0xff] }
 0x277   : > { %v3981_v52 = vmul.f32 %v1701_v17, %v4698_v33 }
 0x278   : > { %vm1679_vm11 = vcmp.ge.f32.partialorder %v1611_v40, 0.0  ;;  %v1689_v2 = vmul.f32 0.2, %v1611_v40  ;;  %vm1680_vm12 = vcmp.ge.f32.partialorder %v1631_v35, 0.0  ;;  %v1690_v61 = vmul.f32 0.2, %v1631_v35 }
 0x27a   : > { %v1700_v20 = vsel %vm1680_vm12, %v1631_v35, %v1690_v61  ;;  %v1699_v28 = vsel %vm1679_vm11, %v1611_v40, %v1689_v2 }
 0x27b   : > { %v3970_v19 = vmul.f32 %v1700_v20, %v4696_v21  ;;  %2786 = vrot.lane.b32.xlu2 %v2780_v43, %s2978_s15  ;;  %v3977_v54 = vmul.f32 %v1699_v28, %v4697_v63 }
 0x27c   : > { %2821 = vrot.lane.b32.xlu1 %v2820_v16, %s2976_s29 }
 0x27d   : > { %v2810_v36 = vpack.i.bf16 %v3959_v41, %v3970_v19  ;;  %v2845_v0 = vpack.i.bf16 %v3977_v54, %v3981_v52  ;;  %v2825_v47 = vpack.i.bf16 %v3970_v19, %v3984_v11 }
 0x27f   : > { %2811 = vrot.lane.b32.xlu0 %v2810_v36, %s2978_s15 }
 0x283   : > { %2806 = vrot.lane.b32.xlu2 %v2810_v36, %s2977_s30 }
 0x284   : > { %2846 = vrot.lane.b32.xlu1 %v2845_v0, %s2977_s30 }
 0x287   : > { %2831 = vrot.lane.b32.xlu0 %v2830_v14, %s2977_s30 }
 0x28b   : > { %2826 = vrot.lane.b32.xlu2 %v2825_v47, %s2975_s28 }
 0x28f   : > { %2841 = vrot.lane.b32.xlu0 %v2845_v0, %s2975_s28 }
 0x293   : > { %2836 = vrot.lane.b32.xlu2 %v2835_v49, %s2978_s15 }
 0x29b   : > { %2851 = vrot.lane.b32.xlu2 %v2845_v0, %s2976_s29 }
 0x2c5   : > { %v4001_v53 = vpop.permute.xlu2 %2776 }
 0x2c6   : > { %v2778_v36 = vunpack.i.l.bf16 %v4001_v53 }
 0x2cd   : > { %v2782_v22 = vpop.permute.xlu2 %2781 }
 0x2ce   : > { %v2784_v26 = vunpack.i.h.bf16 %v2782_v22  ;;  %v2783_v42 = vunpack.i.l.bf16 %v2782_v22 }
 0x2d0   : > { %v4003_v56 = vpop.permute.xlu1 %2796  ;;  %v4016_v10 = vsel %vm1079_vm1, %v2783_v42, %v2784_v26 }
 0x2d1   : > { %v2799_v28 = vunpack.i.h.bf16 %v4003_v56  ;;  %v2798_v17 = vunpack.i.l.bf16 %v4003_v56 }
 0x2d3   : > { %v4082_v0 = vsel %vm1048_vm15, %v2799_v28, %v2778_v36  ;;  %v4086_v14 = vsel %vm1048_vm15, %v2798_v17, %v2799_v28 }
 0x2d4   : > { %v2870_v56 = vpack.i.bf16 %v4082_v0, %v4086_v14 }
 0x2d5   : > { %v4032_v62 = vpop.permute.xlu2 %2786 }
 0x2dd   : > { %v4005_v44 = vpop.permute.xlu0 %2791  ;;  %v4058_v40 = vpop.permute.xlu2 %2806 }
 0x2de   : > { %v2793_v5 = vunpack.i.l.bf16 %v4005_v44  ;;  %v4008_v1 = vpop.permute.xlu1 %2801  ;;  %v2794_v50 = vunpack.i.h.bf16 %v4005_v44  ;;  %v2808_v2 = vunpack.i.l.bf16 %v4058_v40 }
 0x2df   : > { %v2803_v27 = vunpack.i.l.bf16 %v4008_v1 }
 0x2e0   : > { %v4012_v8 = vsel %vm1079_vm1, %v2784_v26, %v2793_v5  ;;  %v4024_v7 = vsel %vm1079_vm1, %v2794_v50, %v2783_v42 }
 0x2e1   : > { %v2855_v6 = vpack.i.bf16 %v4012_v8, %v4016_v10  ;;  %v2865_v60 = vpack.i.bf16 %v4016_v10, %v4024_v7 }
 0x2e3   : > { %2856 = vrot.lane.b32.xlu0 %v2855_v6, %s2976_s29 }
 0x2e5   : > { %v2827_v46 = vpop.permute.xlu2 %2826 }
 0x2e6   : > { %v2817_v59 = vpop.permute.xlu1 %2816  ;;  %v2829_v49 = vunpack.i.h.bf16 %v2827_v46 }
 0x2e7   : > { %v2819_v31 = vunpack.i.h.bf16 %v2817_v59  ;;  %v2818_v25 = vunpack.i.l.bf16 %v2817_v59 }
 0x2e9   : > { %v4028_v45 = vsel %vm1079_vm1, %v2818_v25, %v2819_v31  ;;  %v4044_v30 = vsel %vm1079_vm1, %v2793_v5, %v2818_v25 }
 0x2ea   : > { %v2890_v43 = vpack.i.bf16 %v3932_v15, %v4028_v45  ;;  %v2895_v12 = vpack.i.bf16 %v4044_v30, %v4012_v8  ;;  %v2905_v16 = vpack.i.bf16 %v3977_v54, %v4028_v45 }
 0x2eb   : > { %2866 = vrot.lane.b32.xlu0 %v2865_v60, %s2978_s15  ;;  %v2828_v60 = vunpack.i.l.bf16 %v2827_v46 }
 0x2ec   : > { %2891 = vrot.lane.b32.xlu2 %v2890_v43, %s2976_s29  ;;  %v2885_v43 = vpack.i.bf16 %v4044_v30, %v4024_v7 }
 0x2ee   : > { %v4038_v48 = vpop.permute.xlu1 %2821 }
 0x2ef   : > { %v4643_v58 = vunpack.i.l.bf16 %v4038_v48  ;;  %v4645_v21 = vunpack.i.h.bf16 %v4038_v48 }
 0x2f1   : > { %v4046_v13 = vpop.permute.xlu0 %2811  ;;  %v4054_v4 = vsel %vm1141_vm2, %v2803_v27, %v4643_v58 }
 0x2f4   : > { %2896 = vrot.lane.b32.xlu2 %v2895_v12, %s2978_s15 }
 0x2f6   : > { %v4061_v35 = vpop.permute.xlu1 %2846 }
 0x2f7   : > { %v2849_v61 = vunpack.i.h.bf16 %v4061_v35  ;;  %v2848_v25 = vunpack.i.l.bf16 %v4061_v35  ;;  %v2779_v35 = vunpack.i.h.bf16 %v4001_v53 }
 0x2f9   : > { %v4065_v24 = vpop.permute.xlu0 %2831  ;;  %v4069_v34 = vsel %vm1048_vm15, %v2849_v61, %v2808_v2 }
 0x2fa   : > { %v2860_v20 = vpack.i.bf16 %v4069_v34, %v3959_v41  ;;  %v2833_v12 = vunpack.i.l.bf16 %v4065_v24 }
 0x2fc   : > { %2861 = vrot.lane.b32.xlu1 %v2860_v20, %s2976_s29  ;;  %2906 = vrot.lane.b32.xlu2 %v2905_v16, %s2978_s15  ;;  %v4120_v20 = vsel %vm1079_vm1, %v2828_v60, %v2794_v50  ;;  %v4135_v50 = vsel %vm1048_vm15, %v2778_v36, %v2779_v35 }
 0x301   : > { %v2842_v47 = vpop.permute.xlu0 %2841 }
 0x302   : > { %v2844_v22 = vunpack.i.h.bf16 %v2842_v47  ;;  %v2843_v26 = vunpack.i.l.bf16 %v2842_v47  ;;  %v2834_v47 = vunpack.i.h.bf16 %v4065_v24 }
 0x304   : > { %2871 = vrot.lane.b32.xlu1 %v2870_v56, %s2976_s29  ;;  %v4093_v42 = vsel %vm1079_vm1, %v2829_v49, %v2843_v26  ;;  %v4097_v44 = vsel %vm1079_vm1, %v2844_v22, %v2829_v49  ;;  %v4101_v5 = vsel %vm1079_vm1, %v2819_v31, %v2844_v22  ;;  %v4114_v31 = vsel %vm1048_vm15, %v2808_v2, %v2848_v25 }
 0x305   : > { %v2935_v6 = vpack.i.bf16 %v4093_v42, %v4097_v44  ;;  %v2875_v59 = vpack.i.bf16 %v3970_v19, %v4101_v5  ;;  %v2955_v16 = vpack.i.bf16 %v4120_v20, %v4114_v31  ;;  %v2880_v28 = vpack.i.bf16 %v4082_v0, %v4101_v5 }
 0x306   : > { %v4131_v2 = vsel %vm1048_vm15, %v2779_v35, %v2833_v12  ;;  %v4141_v46 = vsel %vm1079_vm1, %v2843_v26, %v2828_v60  ;;  %v2910_v22 = vpack.i.bf16 %v3935_v37, %v4120_v20  ;;  %v4153_v36 = vsel %vm1048_vm15, %v2834_v47, %v2798_v17  ;;  %v4200_v35 = vpop.permute.xlu2 %2836 }
 0x307   : > { %2936 = vrot.lane.b32.xlu2 %v2935_v6, %s2978_s15  ;;  %2876 = vrot.lane.b32.xlu0 %v2875_v59, %s2976_s29  ;;  %v2900_v53 = vpack.i.bf16 %v4131_v2, %v4135_v50  ;;  %v2960_v49 = vpack.i.bf16 %v4141_v46, %v4069_v34  ;;  %v2920_v26 = vpack.i.bf16 %v4086_v14, %v4153_v36  ;;  %v2809_v6 = vunpack.i.h.bf16 %v4058_v40 }
 0x308   : > { %v2915_v24 = vpack.i.bf16 %v4153_v36, %v4097_v44  ;;  %v4165_v56 = vsel %vm1048_vm15, %v2848_v25, %v2834_v47  ;;  %v2925_v59 = vpack.i.bf16 %v4141_v46, %v4093_v42 }
 0x309   : > { %v2940_v17 = vpack.i.bf16 %v4165_v56, %v4135_v50  ;;  %v4176_v60 = vsel %vm1048_vm15, %v2809_v6, %v2849_v61 }
 0x30a   : > { %v2945_v25 = vpack.i.bf16 %v4176_v60, %v3956_v32 }
 0x30c   : > { %2886 = vrot.lane.b32.xlu1 %v2885_v43, %s2976_s29  ;;  %v4182_v43 = vsel %vm1048_vm15, %v2833_v12, %v2809_v6  ;;  %v2215_v12 = vld [vmem:[%s4608_s10] sm:$0x7]  ;;  %vm1960_vm15 = vcmask 588800  }
 0x30d   : > { %v2930_v40 = vpack.i.bf16 %v4182_v43, %v4176_v60  ;;  %v2950_v61 = vpack.i.bf16 %v4131_v2, %v4182_v43 }
 0x30f   : > { %2956 = vrot.lane.b32.xlu2 %v2955_v16, %s2976_s29  ;;  %2881 = vrot.lane.b32.xlu0 %v2880_v28, %s2978_s15  ;;  %v4202_v16 = vpop.permute.xlu2 %2851 }
 0x314   : > { %2901 = vrot.lane.b32.xlu1 %v2900_v53, %s2976_s29 }
 0x317   : > { %2961 = vrot.lane.b32.xlu2 %v2960_v49, %s2978_s15  ;;  %2911 = vrot.lane.b32.xlu0 %v2910_v22, %s2978_s15 }
 0x31c   : > { %2921 = vrot.lane.b32.xlu1 %v2920_v26, %s2978_s15 }
 0x31f   : > { %1849 = vrot.lane.b32.xlu2 %v3981_v52, %s2978_s15  ;;  %2916 = vrot.lane.b32.xlu0 %v2915_v24, %s2976_s29 }
 0x324   : > { %2941 = vrot.lane.b32.xlu1 %v2940_v17, %s2978_s15 }
 0x327   : > { %2926 = vrot.lane.b32.xlu0 %v2925_v59, %s2976_s29 }
 0x32c   : > { %2946 = vrot.lane.b32.xlu1 %v2945_v25, %s2978_s15 }
 0x32f   : > { %2931 = vrot.lane.b32.xlu0 %v2930_v40, %s2976_s29 }
 0x334   : > { %1881 = vrot.lane.b32.xlu1 %v3984_v11, %s2976_s29 }
 0x337   : > { %2951 = vrot.lane.b32.xlu0 %v2950_v61, %s2978_s15 }
 0x33c   : > { %1789 = vrot.lane.b32.xlu1 %v4114_v31, %s2978_s15 }
 0x33f   : > { %1821 = vrot.lane.b32.xlu0 %v4165_v56, %s2976_s29 }
 0x346   : > { %v4206_v22 = vpop.permute.xlu2 %2891 }
 0x347   : > { %2218 = vperm.xlu0 %2628, %v2215_v12   ;;  %v2894_v24 = vunpack.i.h.bf16 %v4206_v22 }
 0x349   : > { %v1890_v25 = vsel %vm1141_vm2, %v2894_v24, %v2803_v27 }
 0x355   : > { %v2857_v28 = vpop.permute.xlu0 %2856 }
 0x356   : > { %v2859_v53 = vunpack.i.h.bf16 %v2857_v28  ;;  %v2858_v47 = vunpack.i.l.bf16 %v2857_v28  ;;  %v2893_v28 = vunpack.i.l.bf16 %v4206_v22 }
 0x358   : > { %v1950_v49 = vsel %vm1141_vm2, %v2858_v47, %v2859_v53 }
 0x359   : > { %1991 = vmatpush.msrb.mxu1 %v1950_v49  ;;  %v4226_v49 = vpop.permute.xlu2 %2896 }
 0x35a   : > { %v4646_v3 = vunpack.i.h.bf16 %v4226_v49  ;;  %v2898_v33 = vunpack.i.l.bf16 %v4226_v49 }
 0x35b   : > { %1992 = vmatpush.msrb.mxu1 %v4016_v10 }
 0x35d   : > { %v2867_v26 = vpop.permute.xlu0 %2866 }
 0x35e   : > { %v2869_v17 = vunpack.i.h.bf16 %v2867_v26  ;;  %v2868_v6 = vunpack.i.l.bf16 %v2867_v26 }
 0x360   : > { %v1921_v59 = vsel %vm1110_vm3, %v2868_v6, %v2869_v17 }
 0x361   : > { %1993 = vmatpush.msrb.mxu1 %v1921_v59 }
 0x363   : > { %1994 = vmatpush.msrb.mxu1 %v1890_v25 }
 0x365   : > { %1995 = vmatpush.msrb.mxu1 %v3932_v15 }
 0x36e   : > { %v4217_v40 = vpop.permute.xlu1 %2861 }
 0x376   : > { %v4219_v10 = vpop.permute.xlu1 %2871 }
 0x379   : > { %v4221_v61 = vpop.permute.xlu0 %2876 }
 0x37e   : > { %v4223_v12 = vpop.permute.xlu1 %2886 }
 0x37f   : > { %v2889_v26 = vunpack.i.h.bf16 %v4223_v12  ;;  %v4644_v59 = vunpack.i.l.bf16 %v4223_v12 }
 0x381   : > { %v4230_v27 = vpop.permute.xlu0 %2881  ;;  %v1951_v15 = vsel %vm1141_vm2, %v4644_v59, %v2858_v47  ;;  %v1949_v25 = vsel %vm1141_vm2, %v2859_v53, %v2889_v26  ;;  %v1948_v58 = vsel %vm1141_vm2, %v2889_v26, %v2893_v28  ;;  %v1920_v53 = vsel %vm1110_vm3, %v2869_v17, %v2898_v33  ;;  %v4279_v59 = vpop.permute.xlu2 %2906 }
 0x382   : > { %1971 = vmatpush.msrb.mxu0 %v1951_v15  ;;  %2011 = vmatpush.msrb.mxu2 %v1949_v25  ;;  %v1919_v26 = vsel %vm1110_vm3, %v2898_v33, %v4646_v3  ;;  %v2788_v15 = vunpack.i.l.bf16 %v4032_v62  ;;  %v2874_v25 = vunpack.i.h.bf16 %v4219_v10 }
 0x383   : > { %2031 = vmatpush.msrb.mxu3 %v1948_v58  ;;  %v2789_v58 = vunpack.i.h.bf16 %v4032_v62  ;;  %v2873_v62 = vunpack.i.l.bf16 %v4219_v10 }
 0x384   : > { %1972 = vmatpush.msrb.mxu0 %v4024_v7  ;;  %2012 = vmatpush.msrb.mxu2 %v4012_v8  ;;  %v4700_v8 = vunpack.i.l.bf16 %v4038_v48 }
 0x385   : > { %2032 = vmatpush.msrb.mxu3 %v4044_v30  ;;  %v2838_v30 = vunpack.i.l.bf16 %v4200_v35 }
 0x386   : > { %v4250_v47 = vpop.permute.xlu1 %2901  ;;  %2013 = vmatpush.msrb.mxu2 %v1920_v53  ;;  %v1888_v7 = vsel %vm1141_vm2, %v4700_v8, %v4645_v21 }
 0x387   : > { %2033 = vmatpush.msrb.mxu3 %v1919_v26  ;;  %v2903_v17 = vunpack.i.l.bf16 %v4250_v47  ;;  %v2904_v8 = vunpack.i.h.bf16 %v4250_v47 }
 0x388   : > { %2014 = vmatpush.msrb.mxu2 %v4054_v4  ;;  %v1860_v4 = vsel %vm1110_vm3, %v2788_v15, %v2789_v58 }
 0x389   : > { %2034 = vmatpush.msrb.mxu3 %v1888_v7  ;;  %v4267_v33 = vpop.permute.xlu0 %2911  ;;  %v2804_v7 = vunpack.i.h.bf16 %v4008_v1 }
 0x38a   : > { %v2914_v53 = vunpack.i.h.bf16 %v4267_v33  ;;  %v2913_v26 = vunpack.i.l.bf16 %v4267_v33  ;;  %2015 = vmatpush.msrb.mxu2 %v3941_v39  ;;  %v1859_v39 = vsel %vm1110_vm3, %v2789_v58, %v2838_v30  ;;  %v1828_v58 = vsel %vm1141_vm2, %v2903_v17, %v2904_v8 }
 0x38b   : > { %2035 = vmatpush.msrb.mxu3 %v3944_v57  ;;  %v1829_v57 = vsel %vm1141_vm2, %v2874_v25, %v2903_v17  ;;  %v4317_v17 = vld [vmem:[%s4605_s7] sm:$0xff] }
 0x38c   : > { %v1922_v10 = vsel %vm1110_vm3, %v2913_v26, %v2868_v6  ;;  %v1861_v21 = vsel %vm1110_vm3, %v2914_v53, %v2788_v15  ;;  %2016 = vmatpush.msrb.mxu2 %v1860_v4  ;;  %v1891_v6 = vsel %vm1141_vm2, %v2804_v7, %v2894_v24  ;;  %v1830_v15 = vsel %vm1141_vm2, %v2873_v62, %v2874_v25 }
 0x38d   : > { %1973 = vmatpush.msrb.mxu0 %v1922_v10  ;;  %1996 = vmatpush.msrb.mxu1 %v1861_v21  ;;  %v2884_v21 = vunpack.i.h.bf16 %v4230_v27 }
 0x38e   : > { %2036 = vmatpush.msrb.mxu3 %v1859_v39  ;;  %v2922_v3 = vpop.permute.xlu1 %2921  ;;  %2017 = vmatpush.msrb.mxu2 %v1829_v57  ;;  %v4648_v39 = vunpack.i.h.bf16 %v4200_v35 }
 0x38f   : > { %v2924_v4 = vunpack.i.h.bf16 %v2922_v3  ;;  %v2923_v10 = vunpack.i.l.bf16 %v2922_v3  ;;  %1974 = vmatpush.msrb.mxu0 %v1891_v6  ;;  %1997 = vmatpush.msrb.mxu1 %v1830_v15  ;;  %v4327_v6 = vpop.permute.xlu2 %2936  ;;  %v2883_v15 = vunpack.i.l.bf16 %v4230_v27  ;;  %v2863_v27 = vunpack.i.l.bf16 %v4217_v40 }
 0x390   : > { %2037 = vmatpush.msrb.mxu3 %v1828_v58  ;;  %2018 = vmatpush.msrb.mxu2 %v4082_v0  ;;  %v2878_v0 = vunpack.i.l.bf16 %v4221_v61  ;;  %v1862_v57 = vsel %vm1110_vm3, %v4648_v39, %v2914_v53  ;;  %v2908_v53 = vunpack.i.l.bf16 %v4279_v59  ;;  %v2939_v22 = vunpack.i.h.bf16 %v4327_v6 }
 0x391   : > { %v4306_v24 = vpop.permute.xlu0 %2916  ;;  %1975 = vmatpush.msrb.mxu0 %v3935_v37  ;;  %1998 = vmatpush.msrb.mxu1 %v4086_v14  ;;  %v1801_v3 = vsel %vm1110_vm3, %v2923_v10, %v2924_v4  ;;  %v1800_v25 = vsel %vm1110_vm3, %v2924_v4, %v2884_v21 }
 0x392   : > { %2038 = vmatpush.msrb.mxu3 %v4135_v50  ;;  %v4647_v37 = vunpack.i.h.bf16 %v4306_v24  ;;  %v2918_v14 = vunpack.i.l.bf16 %v4306_v24  ;;  %2019 = vmatpush.msrb.mxu2 %v1800_v25 }
 0x393   : > { %1976 = vmatpush.msrb.mxu0 %v1862_v57  ;;  %1999 = vmatpush.msrb.mxu1 %v1801_v3  ;;  %v1917_v57 = vsel %vm1110_vm3, %v2908_v53, %v2883_v15 }
 0x394   : > { %2592 = vmatmul.msk.f32.vlgmr.msrb.gmra.mxu1 %vm1960_vm15, %v4317_v17  ;;  %v1831_v50 = vsel %vm1141_vm2, %v4647_v37, %v2873_v62  ;;  %v1946_v4 = vsel %vm1141_vm2, %v2878_v0, %v2918_v14  ;;  %2593 = vmatmul.msk.f32.vlgmr.msrb.gmra.mxu2 %vm1960_vm15, %v4317_v17  ;;  %v2854_v62 = vunpack.i.h.bf16 %v4202_v16 }
 0x395   : > { %1977 = vmatpush.msrb.mxu0 %v1831_v50  ;;  %2071 = vmatpush.msra.mxu1 %v1946_v4 }
 0x396   : > { %v4342_v58 = vpop.permute.xlu1 %2941  ;;  %v1886_v39 = vsel %vm1141_vm2, %v2863_v27, %v2854_v62 }
 0x397   : > { %v4649_v3 = vunpack.i.h.bf16 %v4342_v58  ;;  %v2943_v25 = vunpack.i.l.bf16 %v4342_v58  ;;  %1978 = vmatpush.msrb.mxu0 %v4153_v36  ;;  %2072 = vmatpush.msra.mxu1 %v4101_v5 }
 0x399   : > { %v4351_v50 = vpop.permute.xlu0 %2926  ;;  %2073 = vmatpush.msra.mxu1 %v1917_v57  ;;  %v1802_v4 = vsel %vm1110_vm3, %v4649_v3, %v2923_v10  ;;  %v1799_v36 = vsel %vm1110_vm3, %v2884_v21, %v2943_v25  ;;  %v1947_v10 = vsel %vm1141_vm2, %v2893_v28, %v2878_v0  ;;  %v1954_v57 = vld [vmem:[%s4606_s8] sm:$0xff]  ;;  %v2938_v28 = vunpack.i.l.bf16 %v4327_v6  ;;  %v4385_v0 = vpop.permute.xlu2 %2956 }
 0x39a   : > { %v2929_v5 = vunpack.i.h.bf16 %v4351_v50  ;;  %v2928_v37 = vunpack.i.l.bf16 %v4351_v50  ;;  %1979 = vmatpush.msrb.mxu0 %v1802_v4  ;;  %2039 = vmatpush.msrb.mxu3 %v1799_v36 }
 0x39b   : > { %2074 = vmatpush.msra.mxu1 %v1886_v39  ;;  %2591 = vmatmul.msk.f32.vlgmr.msrb.gmra.mxu0 %vm1960_vm15, %v4317_v17 }
 0x39c   : > { %2594 = vmatmul.msk.f32.vlgmr.msrb.gmra.mxu3 %vm1960_vm15, %v4317_v17  ;;  %2051 = vmatpush.msra.mxu0 %v1947_v10  ;;  %v1945_v21 = vsel %vm1141_vm2, %v2918_v14, %v2928_v37  ;;  %v1944_v39 = vsel %vm1141_vm2, %v2928_v37, %v2929_v5  ;;  %v2879_v14 = vunpack.i.h.bf16 %v4221_v61  ;;  %v2814_v37 = vunpack.i.h.bf16 %v4046_v13 }
 0x39d   : > { %2075 = vmatpush.msra.mxu1 %v3959_v41  ;;  %2091 = vmatpush.msra.mxu2 %v1945_v21  ;;  %v4701_v10 = vunpack.i.h.bf16 %v4226_v49  ;;  %v1916_v41 = vsel %vm1110_vm3, %v2883_v15, %v2938_v28  ;;  %v4702_v49 = vunpack.i.h.bf16 %v4038_v48 }
 0x39e   : > { %2111 = vmatpush.msra.mxu3 %v1944_v39  ;;  %2052 = vmatpush.msra.mxu0 %v4028_v45  ;;  %v2947_v4 = vpop.permute.xlu1 %2946  ;;  %v2853_v45 = vunpack.i.l.bf16 %v4202_v16  ;;  %v1885_v39 = vsel %vm1141_vm2, %v2854_v62, %v2879_v14  ;;  %v4704_v16 = vunpack.i.h.bf16 %v4200_v35  ;;  %v4706_v35 = vunpack.i.h.bf16 %v4342_v58 }
 0x39f   : > { %v2948_v36 = vunpack.i.l.bf16 %v2947_v4  ;;  %2092 = vmatpush.msra.mxu2 %v4097_v44  ;;  %v1918_v3 = vsel %vm1110_vm3, %v4701_v10, %v2908_v53  ;;  %1957 = vperm.xlu2 %2965, %v1954_v57   ;;  %v1915_v44 = vsel %vm1110_vm3, %v2938_v28, %v2939_v22  ;;  %v1887_v53 = vsel %vm1141_vm2, %v4702_v49, %v2863_v27 }
 0x3a0   : > { %2112 = vmatpush.msra.mxu3 %v4093_v42  ;;  %2053 = vmatpush.msra.mxu0 %v1918_v3  ;;  %v2909_v3 = vunpack.i.h.bf16 %v4279_v59  ;;  %v1884_v48 = vsel %vm1141_vm2, %v2879_v14, %v2853_v45  ;;  %v2813_v27 = vunpack.i.l.bf16 %v4046_v13  ;;  %v2864_v57 = vunpack.i.h.bf16 %v4217_v40 }
 0x3a1   : > { %v2932_v61 = vpop.permute.xlu0 %2931  ;;  %2093 = vmatpush.msra.mxu2 %v1916_v41  ;;  %v1857_v42 = vsel %vm1110_vm3, %v2948_v36, %v2814_v37  ;;  %v1858_v62 = vsel %vm1110_vm3, %v2838_v30, %v2948_v36  ;;  %v2958_v28 = vunpack.i.l.bf16 %v4385_v0  ;;  %v2962_v40 = vpop.permute.xlu2 %2961  ;;  %v2949_v30 = vunpack.i.h.bf16 %v2947_v4 }
 0x3a2   : > { %v2934_v15 = vunpack.i.h.bf16 %v2932_v61  ;;  %v2933_v21 = vunpack.i.l.bf16 %v2932_v61  ;;  %2113 = vmatpush.msra.mxu3 %v1915_v44  ;;  %2054 = vmatpush.msra.mxu0 %v1887_v53  ;;  %v1855_v13 = vsel %vm1110_vm3, %v2909_v3, %v2813_v27  ;;  %v2963_v47 = vunpack.i.l.bf16 %v2962_v40 }
 0x3a3   : > { %2076 = vmatpush.msra.mxu1 %v1857_v42  ;;  %2094 = vmatpush.msra.mxu2 %v1885_v39 }
 0x3a4   : > { %2114 = vmatpush.msra.mxu3 %v1884_v48  ;;  %2055 = vmatpush.msra.mxu0 %v3956_v32  ;;  %v1826_v59 = vsel %vm1141_vm2, %v2934_v15, %v2933_v21  ;;  %v1856_v32 = vsel %vm1110_vm3, %v2814_v37, %v2909_v3 }
 0x3a5   : > { %2077 = vmatpush.msra.mxu1 %v1826_v59  ;;  %2095 = vmatpush.msra.mxu2 %v3977_v54  ;;  %v1827_v54 = vsel %vm1141_vm2, %v2904_v8, %v2934_v15 }
 0x3a6   : > { %2115 = vmatpush.msra.mxu3 %v3970_v19  ;;  %2056 = vmatpush.msra.mxu0 %v1858_v62  ;;  %v1825_v19 = vsel %vm1141_vm2, %v2933_v21, %v2864_v57  ;;  %v1882_v61 = vpop.permute.xlu1 %1881 }
 0x3a7   : > { %2078 = vmatpush.msra.mxu1 %v4182_v43  ;;  %2096 = vmatpush.msra.mxu2 %v1856_v32  ;;  %v1824_v43 = vsel %vm1141_vm2, %v2864_v57, %v2958_v28 }
 0x3a8   : > { %2116 = vmatpush.msra.mxu3 %v1855_v13  ;;  %2057 = vmatpush.msra.mxu0 %v1827_v54 }
 0x3a9   : > { %v2952_v14 = vpop.permute.xlu0 %2951  ;;  %2097 = vmatpush.msra.mxu2 %v1825_v19 }
 0x3aa   : > { %v2954_v37 = vunpack.i.h.bf16 %v2952_v14  ;;  %v2953_v36 = vunpack.i.l.bf16 %v2952_v14  ;;  %2117 = vmatpush.msra.mxu3 %v1824_v43  ;;  %2058 = vmatpush.msra.mxu0 %v4131_v2  ;;  %v1795_v2 = vsel %vm1110_vm3, %v2949_v30, %v2963_v47 }
 0x3ab   : > { %2098 = vmatpush.msra.mxu2 %v4176_v60  ;;  %v2959_v60 = vunpack.i.h.bf16 %v4385_v0  ;;  %v4703_v0 = vunpack.i.l.bf16 %v4223_v12 }
 0x3ac   : > { %2118 = vmatpush.msra.mxu3 %v4069_v34  ;;  %v1798_v8 = vsel %vm1110_vm3, %v2943_v25, %v2954_v37  ;;  %v1797_v4 = vsel %vm1110_vm3, %v2954_v37, %v2953_v36  ;;  %v1796_v10 = vsel %vm1110_vm3, %v2953_v36, %v2949_v30  ;;  %v2964_v34 = vunpack.i.h.bf16 %v2962_v40 }
 0x3ad   : > { %2059 = vmatpush.msra.mxu0 %v1798_v8  ;;  %2079 = vmatpush.msra.mxu1 %v1797_v4  ;;  %v1943_v25 = vsel %vm1141_vm2, %v2929_v5, %v2959_v60  ;;  %v1952_v41 = vsel %vm1141_vm2, %v2959_v60, %v4703_v0  ;;  %v1883_v5 = vsel %vm1141_vm2, %v2853_v45, %v1882_v61  ;;  %v4707_v60 = vld [vmem:[#allocation7_spill] sm:$0xff] }
 0x3ae   : > { %2099 = vmatpush.msra.mxu2 %v1796_v10  ;;  %2119 = vmatpush.msra.mxu3 %v1795_v2  ;;  %v1914_v50 = vsel %vm1110_vm3, %v2939_v22, %v2964_v34  ;;  %v1913_v12 = vsel %vm1110_vm3, %v2964_v34, %v2913_v26  ;;  %v1790_v22 = vpop.permute.xlu1 %1789 }
 0x3af   : > { %2595 = vmatmul.msk.f32.vlgmr.msra.gmra.mxu0 %vm1960_vm15, %v4317_v17  ;;  %2596 = vmatmul.msk.f32.vlgmr.msra.gmra.mxu1 %vm1960_vm15, %v4317_v17  ;;  %v1793_v45 = vsel %vm1110_vm3, %v1790_v22, %v4706_v35 }
 0x3b0   : > { %2597 = vmatmul.msk.f32.vlgmr.msra.gmra.mxu2 %vm1960_vm15, %v4317_v17  ;;  %2598 = vmatmul.msk.f32.vlgmr.msra.gmra.mxu3 %vm1960_vm15, %v4317_v17 }
 0x3b1   : > { %2131 = vmatpush.msrb.mxu0 %v1943_v25  ;;  %2151 = vmatpush.msrb.mxu1 %v1952_v41  ;;  %v1822_v6 = vpop.permute.xlu0 %1821 }
 0x3b2   : > { %v1823_v1 = vsel %vm1141_vm2, %v2958_v28, %v1822_v6 }
 0x3b3   : > { %2132 = vmatpush.msrb.mxu0 %v4141_v46  ;;  %2152 = vmatpush.msrb.mxu1 %v4120_v20  ;;  %v1892_v20 = vsel %vm1141_vm2, %v1882_v61, %v2804_v7  ;;  %v1850_v46 = vpop.permute.xlu2 %1849  ;;  %v4705_v7 = vunpack.i.h.bf16 %v4306_v24 }
 0x3b4   : > { %v1854_v33 = vsel %vm1110_vm3, %v2813_v27, %v1850_v46  ;;  %v1853_v26 = vsel %vm1110_vm3, %v1850_v46, %v4704_v16 }
 0x3b5   : > { %2133 = vmatpush.msrb.mxu0 %v1914_v50  ;;  %2153 = vmatpush.msrb.mxu1 %v1913_v12 }
 0x3b7   : > { %2134 = vmatpush.msrb.mxu0 %v1883_v5  ;;  %2154 = vmatpush.msrb.mxu1 %v1892_v20  ;;  %v4708_v20 = vld [vmem:[#allocation12_spill] sm:$0xff] }
 0x3b9   : > { %2135 = vmatpush.msrb.mxu0 %v3981_v52  ;;  %2155 = vmatpush.msrb.mxu1 %v3984_v11  ;;  %v1832_v52 = vsel %vm1141_vm2, %v1822_v6, %v4705_v7  ;;  %v1794_v11 = vsel %vm1110_vm3, %v2963_v47, %v1790_v22  ;;  %vm2221_vm2 = vcmask 64512   ;;  %v4709_v6 = vld [vmem:[#allocation8_spill] sm:$0xff] }
 0x3bb   : > { %2136 = vmatpush.msrb.mxu0 %v1854_v33  ;;  %2156 = vmatpush.msrb.mxu1 %v1853_v26  ;;  %v2219_v26 = vpop.permute.xlu0 %2218 }
 0x3bd   : > { %2137 = vmatpush.msrb.mxu0 %v1823_v1  ;;  %2157 = vmatpush.msrb.mxu1 %v1832_v52 }
 0x3bf   : > { %2138 = vmatpush.msrb.mxu0 %v4114_v31  ;;  %2158 = vmatpush.msrb.mxu1 %v4165_v56 }
 0x3c1   : > { %2139 = vmatpush.msrb.mxu0 %v1794_v11  ;;  %2159 = vmatpush.msrb.mxu1 %v1793_v45 }
 0x3c2   : > { %2599 = vmatmul.msk.f32.vlgmr.msrb.gmra.mxu0 %vm1960_vm15, %v4317_v17  ;;  %2600 = vmatmul.msk.f32.vlgmr.msrb.gmra.mxu1 %vm1960_vm15, %v4317_v17  ;;  %v4529_v17 = vld [vmem:[%s4607_s9] sm:$0x7] }
 0x3f9   : > { %v4515_v24 = vpop.permute.xlu2 %1957 }
 0x411   : > { %v2001_v31 = vpop.f32.mrf.mxu1 }
 0x412   : > { %v2002_v56 = vadd.f32 %v2001_v31, %v4515_v24 }
 0x414   : > { %vm2165_vm1 = vcmp.ge.f32.partialorder %v2002_v56, 0.0  ;;  %v2175_v44 = vmul.f32 0.2, %v2002_v56 }
 0x416   : > { %v2185_v23 = vsel %vm2165_vm1, %v2002_v56, %v2175_v44 }
 0x417   : > { %v2195_v58 = vmul.f32 %v2185_v23, %v4690_v29  ;;  %v2021_v49 = vpop.f32.mrf.mxu2 }
 0x418   : > { %v1981_v53 = vpop.f32.mrf.mxu0  ;;  %v2022_v42 = vadd.f32 %v2021_v49, %v4515_v24 }
 0x419   : > { %2205 = vst [vmem:[%s4523_s13 + $0x8] sm:$0xff] %v2195_v58  ;;  %v1982_v3 = vadd.f32 %v1981_v53, %v4515_v24  ;;  %2260 = vmatpush.msrb.mxu3 %v2195_v58 }
 0x41a   : > { %2602 = vmatmul.msk.f32.vlgmr.msrb.gmra.mxu3 %vm2221_vm2, %v4529_v17  ;;  %vm2166_vm3 = vcmp.ge.f32.partialorder %v2022_v42, 0.0  ;;  %v2176_v29 = vmul.f32 0.2, %v2022_v42 }
 0x41b   : > { %vm2164_vm4 = vcmp.ge.f32.partialorder %v1982_v3, 0.0  ;;  %v2174_v15 = vmul.f32 0.2, %v1982_v3 }
 0x41c   : > { %v2186_v21 = vsel %vm2166_vm3, %v2022_v42, %v2176_v29 }
 0x41d   : > { %v2184_v39 = vsel %vm2164_vm4, %v1982_v3, %v2174_v15  ;;  %v2196_v48 = vmul.f32 %v2186_v21, %v4692_v9 }
 0x41e   : > { %v2194_v59 = vmul.f32 %v2184_v39, %v4691_v18 }
 0x41f   : > { %v2041_v27 = vpop.f32.mrf.mxu3  ;;  %2206 = vst [vmem:[%s4523_s13 + $0x10] sm:$0xff] %v2196_v48 }
 0x420   : > { %2204 = vst [vmem:[%s4523_s13] sm:$0xff] %v2194_v59  ;;  %v2042_v57 = vadd.f32 %v2041_v27, %v4515_v24  ;;  %2240 = vmatpush.msrb.mxu2 %v2194_v59 }
 0x421   : > { %2601 = vmatmul.msk.f32.vlgmr.msrb.gmra.mxu2 %vm2221_vm2, %v4529_v17 }
 0x422   : > { %vm2167_vm5 = vcmp.ge.f32.partialorder %v2042_v57, 0.0  ;;  %v2177_v62 = vmul.f32 0.2, %v2042_v57  ;;  %2280 = vmatpush.msra.mxu2 %v2196_v48 }
 0x424   : > { %v2187_v32 = vsel %vm2167_vm5, %v2042_v57, %v2177_v62 }
 0x425   : > { %v2197_v28 = vmul.f32 %v2187_v32, %v4693_v55 }
 0x427   : > { %2207 = vst [vmem:[%s4523_s13 + $0x18] sm:$0xff] %v2197_v28  ;;  %2300 = vmatpush.msra.mxu3 %v2197_v28 }
 0x428   : > { %2604 = vmatmul.msk.f32.vlgmr.msra.gmra.mxu3 %vm2221_vm2, %v4529_v17 }
 0x429   : > { %2603 = vmatmul.msk.f32.vlgmr.msra.gmra.mxu2 %vm2221_vm2, %v4529_v17 }
 0x42c   : > { %v2061_v18 = vpop.f32.mrf.mxu0  ;;  %v2081_v9 = vpop.f32.mrf.mxu1 }
 0x42d   : > { %v2062_v13 = vadd.f32 %v2061_v18, %v4515_v24  ;;  %v2082_v54 = vadd.f32 %v2081_v9, %v4515_v24 }
 0x42f   : > { %vm2168_vm6 = vcmp.ge.f32.partialorder %v2062_v13, 0.0  ;;  %v2178_v40 = vmul.f32 0.2, %v2062_v13  ;;  %vm2169_vm7 = vcmp.ge.f32.partialorder %v2082_v54, 0.0  ;;  %v2179_v55 = vmul.f32 0.2, %v2082_v54 }
 0x431   : > { %v2188_v19 = vsel %vm2168_vm6, %v2062_v13, %v2178_v40  ;;  %v2189_v30 = vsel %vm2169_vm7, %v2082_v54, %v2179_v55 }
 0x432   : > { %v2198_v14 = vmul.f32 %v2188_v19, %v4694_v38  ;;  %v2199_v43 = vmul.f32 %v2189_v30, %v4695_v51 }
 0x433   : > { %v2101_v37 = vpop.f32.mrf.mxu2  ;;  %v2121_v36 = vpop.f32.mrf.mxu3 }
 0x434   : > { %2208 = vst [vmem:[%s4523_s13 + $0x20] sm:$0xff] %v2198_v14  ;;  %v2102_v47 = vadd.f32 %v2101_v37, %v4515_v24  ;;  %v2122_v8 = vadd.f32 %v2121_v36, %v4515_v24  ;;  %2320 = vmatpush.msra.mxu0 %v2198_v14  ;;  %2340 = vmatpush.msra.mxu1 %v2199_v43 }
 0x435   : > { %2209 = vst [vmem:[%s4523_s13 + $0x28] sm:$0xff] %v2199_v43  ;;  %2605 = vmatmul.msk.f32.vlgmr.msra.gmra.mxu0 %vm2221_vm2, %v4529_v17  ;;  %2606 = vmatmul.msk.f32.vlgmr.msra.gmra.mxu1 %vm2221_vm2, %v4529_v17 }
 0x436   : > { %vm2170_vm8 = vcmp.ge.f32.partialorder %v2102_v47, 0.0  ;;  %v2180_v38 = vmul.f32 0.2, %v2102_v47  ;;  %vm2171_vm9 = vcmp.ge.f32.partialorder %v2122_v8, 0.0  ;;  %v2181_v51 = vmul.f32 0.2, %v2122_v8 }
 0x438   : > { %v2190_v4 = vsel %vm2170_vm8, %v2102_v47, %v2180_v38  ;;  %v2191_v10 = vsel %vm2171_vm9, %v2122_v8, %v2181_v51 }
 0x439   : > { %v2200_v2 = vmul.f32 %v2190_v4, %v4697_v63  ;;  %v2201_v34 = vmul.f32 %v2191_v10, %v4707_v60 }
 0x43b   : > { %2210 = vst [vmem:[%s4523_s13 + $0x30] sm:$0xff] %v2200_v2  ;;  %2360 = vmatpush.msrb.mxu2 %v2200_v2  ;;  %2380 = vmatpush.msrb.mxu3 %v2201_v34 }
 0x43c   : > { %2211 = vst [vmem:[%s4523_s13 + $0x38] sm:$0xff] %v2201_v34  ;;  %2607 = vmatmul.msk.f32.vlgmr.msrb.gmra.mxu2 %vm2221_vm2, %v4529_v17  ;;  %2608 = vmatmul.msk.f32.vlgmr.msrb.gmra.mxu3 %vm2221_vm2, %v4529_v17 }
 0x43f   : > { %v2141_v25 = vpop.f32.mrf.mxu0  ;;  %v2161_v0 = vpop.f32.mrf.mxu1 }
 0x440   : > { %v2142_v41 = vadd.f32 %v2141_v25, %v4515_v24  ;;  %v2162_v63 = vadd.f32 %v2161_v0, %v4515_v24 }
 0x442   : > { %vm2172_vm10 = vcmp.ge.f32.partialorder %v2142_v41, 0.0  ;;  %v2182_v61 = vmul.f32 0.2, %v2142_v41  ;;  %vm2173_vm11 = vcmp.ge.f32.partialorder %v2162_v63, 0.0  ;;  %v2183_v50 = vmul.f32 0.2, %v2162_v63 }
 0x444   : > { %v2192_v12 = vsel %vm2172_vm10, %v2142_v41, %v2182_v61  ;;  %v2193_v5 = vsel %vm2173_vm11, %v2162_v63, %v2183_v50 }
 0x445   : > { %v2202_v46 = vmul.f32 %v2192_v12, %v4708_v20  ;;  %v2203_v33 = vmul.f32 %v2193_v5, %v4709_v6 }
 0x447   : > { %2212 = vst [vmem:[%s4523_s13 + $0x40] sm:$0xff] %v2202_v46  ;;  %2400 = vmatpush.msrb.mxu0 %v2202_v46  ;;  %2420 = vmatpush.msrb.mxu1 %v2203_v33 }
 0x448   : > { %2213 = vst [vmem:[%s4523_s13 + $0x48] sm:$0xff] %v2203_v33  ;;  %2609 = vmatmul.msk.f32.vlgmr.msrb.gmra.mxu0 %vm2221_vm2, %v4529_v17  ;;  %2610 = vmatmul.msk.f32.vlgmr.msrb.gmra.mxu1 %vm2221_vm2, %v4529_v17 }
 0x49d   : > { %v2262_v16 = vpop.f32.mrf.mxu3 }
 0x49e   : > { %v2263_v1 = vadd.f32 %v2262_v16, %v2219_v26 }
 0x4a0   : > { %v2435_v52 = vrot.slane %v2263_v1, 4 }
 0x4a4   : > { %v2242_v7 = vpop.f32.mrf.mxu2 }
 0x4a5   : > { %v2243_v22 = vadd.f32 %v2242_v7, %v2219_v26 }
 0x4a7   : > { %v2440_v11 = vsel %vm743_vm0, %v2243_v22, %v2435_v52 }
 0x4a8   : > { %2450 = vst [vmem:[%s4583_s18] sm:$0x77] %v2440_v11 }
 0x4ab   : > { %v2302_v35 = vpop.f32.mrf.mxu3 }
 0x4ac   : > { %v2303_v45 = vadd.f32 %v2302_v35, %v2219_v26  ;;  %v2282_v24 = vpop.f32.mrf.mxu2 }
 0x4ad   : > { %v2283_v31 = vadd.f32 %v2282_v24, %v2219_v26 }
 0x4ae   : > { %v2436_v56 = vrot.slane %v2303_v45, 4 }
 0x4b0   : > { %v2441_v44 = vsel %vm743_vm0, %v2283_v31, %v2436_v56 }
 0x4b1   : > { %2451 = vst [vmem:[%s4583_s18 + $0x8] sm:$0x77] %v2441_v44 }
 0x4b2   : > { %v2322_v23 = vpop.f32.mrf.mxu0  ;;  %v2342_v58 = vpop.f32.mrf.mxu1 }
 0x4b3   : > { %v2343_v17 = vadd.f32 %v2342_v58, %v2219_v26  ;;  %v2323_v49 = vadd.f32 %v2322_v23, %v2219_v26 }
 0x4b5   : > { %v2437_v53 = vrot.slane %v2343_v17, 4 }
 0x4b7   : > { %v2442_v42 = vsel %vm743_vm0, %v2323_v49, %v2437_v53 }
 0x4b8   : > { %2452 = vst [vmem:[%s4583_s18 + $0x10] sm:$0x77] %v2442_v42 }
 0x4bf   : > { %v2362_v3 = vpop.f32.mrf.mxu2  ;;  %v2382_v29 = vpop.f32.mrf.mxu3 }
 0x4c0   : > { %v2383_v15 = vadd.f32 %v2382_v29, %v2219_v26  ;;  %v2363_v21 = vadd.f32 %v2362_v3, %v2219_v26 }
 0x4c2   : > { %v2438_v39 = vrot.slane %v2383_v15, 4 }
 0x4c4   : > { %v2443_v48 = vsel %vm743_vm0, %v2363_v21, %v2438_v39 }
 0x4c5   : > { %2453 = vst [vmem:[%s4583_s18 + $0x18] sm:$0x77] %v2443_v48  ;;  %v2402_v59 = vpop.f32.mrf.mxu0  ;;  %v2422_v27 = vpop.f32.mrf.mxu1 }
 0x4c6   : > { %v2423_v57 = vadd.f32 %v2422_v27, %v2219_v26  ;;  %v2403_v62 = vadd.f32 %v2402_v59, %v2219_v26 }
 0x4c8   : > { %v2439_v32 = vrot.slane %v2423_v57, 4 }
 0x4ca   : > { %v2444_v28 = vsel %vm743_vm0, %v2403_v62, %v2439_v32 }
 0x4cb   : > { %2454 = vst [vmem:[%s4583_s18 + $0x20] sm:$0x77] %v2444_v28 }
 0x4cc PF: > { %s23_s21 = sadd.s32 1, %s2972_s21  }
 0x4cd   : > { %p20_p4 = scmp.ge.s32.totalorder %s23_s21, 4  }
 0x4cf   :  { %22 = sbr.rel (!%p20_p4) target bundleno = 1 (0x1), region = 106 }

</bundles_post_ra>
